<compile_context>
chip_gen: v6e
topology: v6e:2x2x1
jax: 0.10.0
libtpu: 0.0.40
codegen_flags: <defaults>
</compile_context>

<pallas_src>
import functools

import jax
import jax.numpy as jnp
from jax.experimental import pallas as pl
from jax.experimental.pallas import tpu as pltpu


# ----------------------------------------------------------------------------
# Fused Pallas kernel: num_layers x LSTM + Linear, single invocation per block
# ----------------------------------------------------------------------------
def _fused_lstm_kernel(x_ref, *refs, num_layers, hidden):
    """refs = [wih_0, whh_0, b_0, ..., wih_{L-1}, whh_{L-1}, b_{L-1},
               w_fc, b_fc, out_ref]

    Shapes (all VMEM-resident for the whole forward):
      x_ref   : (B, T, F)    f32   batch-first input block
      wih_l   : (F_in, 4H)   compute dtype (pre-transposed, g-cols pre-scaled by 2)
      whh_l   : (H, 4H)      compute dtype (pre-transposed, g-cols pre-scaled by 2)
      b_l     : (1, 4H)      f32   (b_ih + b_hh, g-cols pre-scaled by 2)
      w_fc    : (H, O)       compute dtype
      b_fc    : (1, O)       f32
      out_ref : (B, T, O)    f32
    """
    H = hidden
    layer_refs = refs[: 3 * num_layers]
    wfc_ref = refs[3 * num_layers]
    bfc_ref = refs[3 * num_layers + 1]
    out_ref = refs[3 * num_layers + 2]

    B, T, F = x_ref.shape
    cdt = wfc_ref.dtype  # MXU operand dtype (bf16 fast path, or f32)

    # (B, T, F) -> (B*T, F). Value-correct always; layout-preserving when T == 8.
    seq2d = x_ref[...].reshape(B * T, F)

    # One-hot time index used to stack per-step h's in vregs (no VMEM round trip).
    t_idx = jax.lax.broadcasted_iota(jnp.int32, (B, T, H), 1)

    for layer in range(num_layers):
        wih_ref, whh_ref, b_ref = layer_refs[3 * layer: 3 * layer + 3]

        # Hoisted input projection + bias for ALL timesteps: one (B*T,Fin)@(Fin,4H)
        # MXU pass; nothing here depends on the recurrence.
        gx = (
            jnp.dot(seq2d.astype(cdt), wih_ref[...],
                    preferred_element_type=jnp.float32)
            + b_ref[...]                                   # (B*T, 4H) f32
        )
        gx3 = gx.reshape(B, T, 4 * H)
        # Pre-split the per-timestep gate slices off the serial chain.
        gx_t = [gx3[:, t, :] for t in range(T)]

        whh = whh_ref[...]                                 # (H, 4H), stays in vregs
        h = jnp.zeros((B, H), jnp.float32)
        c = jnp.zeros((B, H), jnp.float32)
        hs = []

        # Serial recurrence; fully unrolled (T small & static) so every slice index
        # is static. Critical path per step: h@W_hh, one sigmoid, tanh(c), update.
        for t in range(T):
            gates = gx_t[t] + jnp.dot(h.astype(cdt), whh,
                                      preferred_element_type=jnp.float32)
            # PyTorch gate order [i, f, g, o]. One full-vreg EUP push; the g
            # columns were pre-scaled by 2, so tanh(g) = 2*sigmoid(2g) - 1.
            s = jax.nn.sigmoid(gates)                      # (B, 4H) f32
            i_g = s[:, 0 * H:1 * H]
            f_g = s[:, 1 * H:2 * H]
            g_g = 2.0 * s[:, 2 * H:3 * H] - 1.0            # == tanh(g)
            o_g = s[:, 3 * H:4 * H]
            c = f_g * c + i_g * g_g
            h = o_g * jnp.tanh(c)                          # the only other EUP push
            hs.append(h)

        # Stack the per-step h's into (B, T, H) purely in vregs via disjoint
        # one-hot selects (cheap VALU work, off the recurrence critical path).
        seq3 = jnp.zeros((B, T, H), jnp.float32)
        for t, h_t in enumerate(hs):
            seq3 = jnp.where(t_idx == t,
                             jnp.broadcast_to(h_t[:, None, :], (B, T, H)),
                             seq3)
        seq2d = seq3.reshape(B * T, H)                     # feeds next layer / FC

    # Final Linear over all (B*T) rows at once; single dense output store.
    out2d = (
        jnp.dot(seq2d.astype(cdt), wfc_ref[...],
                preferred_element_type=jnp.float32)
        + bfc_ref[...]                                     # (B*T, O) f32
    )
    out_ref[...] = out2d.reshape(out_ref.shape).astype(out_ref.dtype)


# ----------------------------------------------------------------------------
# Wrapper
# ----------------------------------------------------------------------------
@functools.partial(jax.jit, static_argnames=("batch_blocks",))
def lstm_model_forward(x, packed, *, batch_blocks=1):
    """x: (B, T, input_size) f32, batch_first -> (B, T, output_size) f32.

    packed: output of pack_params (pre-transposed, pre-scaled, pre-cast weights).
    batch_blocks: split the batch across a "parallel" grid axis (use 2 on v7x to
    occupy both TensorCores; 1 elsewhere).
    """
    B, T, F = x.shape
    num_layers = (len(packed) - 2) // 3
    H = packed[1].shape[0]          # whh_t: (H, 4H)
    O = packed[-2].shape[1]         # fc_w_t: (H, O)
    assert B % batch_blocks == 0
    bb = B // batch_blocks

    kernel = functools.partial(_fused_lstm_kernel, num_layers=num_layers, hidden=H)

    def replicated(arr):
        nd = arr.ndim
        return pl.BlockSpec(arr.shape, lambda i: (0,) * nd)

    in_specs = [pl.BlockSpec((bb, T, F), lambda i: (i, 0, 0))]
    in_specs += [replicated(p) for p in packed]
    out_specs = pl.BlockSpec((bb, T, O), lambda i: (i, 0, 0))

    return pl.pallas_call(
        kernel,
        out_shape=jax.ShapeDtypeStruct((B, T, O), jnp.float32),
        grid=(batch_blocks,),
        in_specs=in_specs,
        out_specs=out_specs,
        compiler_params=pltpu.CompilerParams(
            dimension_semantics=("parallel",)),
    )(x, *packed)


def pack_params(params, compute_dtype=jnp.bfloat16):
    """One-time packing (call OUTSIDE the per-step wrapper):
      * g-gate columns of W_ih^T, W_hh^T and the fused bias are pre-scaled by 2
        so the kernel gets tanh(g) from the shared sigmoid (2*sigmoid(2g)-1),
      * MXU operands are pre-cast to compute_dtype (bf16 default); biases stay f32.
    """
    H = params["layers"][0]["whh_t"].shape[0]

    def scale_g(a):  # last dim is 4H, PyTorch gate order [i, f, g, o]
        return a.at[..., 2 * H:3 * H].multiply(2.0)

    packed = []
    for lp in params["layers"]:
        packed.append(scale_g(lp["wih_t"]).astype(compute_dtype))       # (F_in, 4H)
        packed.append(scale_g(lp["whh_t"]).astype(compute_dtype))       # (H, 4H)
        packed.append(scale_g(lp["bias"]).reshape(1, -1)
                      .astype(jnp.float32))                             # (1, 4H)
    packed.append(params["fc_w_t"].astype(compute_dtype))               # (H, O)
    packed.append(params["fc_b"].reshape(1, -1).astype(jnp.float32))    # (1, O)
    return tuple(packed)


def init_params(key, input_size, hidden_size, num_layers, output_size):
    """Deterministic init mirroring PyTorch's uniform(-1/sqrt(H), 1/sqrt(H))."""
    params = {"layers": []}
    bound = 1.0 / jnp.sqrt(jnp.asarray(hidden_size, jnp.float32))
    for layer in range(num_layers):
        in_feat = input_size if layer == 0 else hidden_size
        key, k1, k2, k3, k4 = jax.random.split(key, 5)
        wih = jax.random.uniform(k1, (4 * hidden_size, in_feat), jnp.float32,
                                 -bound, bound)
        whh = jax.random.uniform(k2, (4 * hidden_size, hidden_size), jnp.float32,
                                 -bound, bound)
        bih = jax.random.uniform(k3, (4 * hidden_size,), jnp.float32, -bound, bound)
        bhh = jax.random.uniform(k4, (4 * hidden_size,), jnp.float32, -bound, bound)
        params["layers"].append({
            "wih_t": wih.T,              # (in_feat, 4H)
            "whh_t": whh.T,              # (H, 4H)
            "bias": bih + bhh,           # (4H,)
        })
    key, k5, k6 = jax.random.split(key, 3)
    w_fc = jax.random.uniform(k5, (output_size, hidden_size), jnp.float32,
                              -bound, bound)
    b_fc = jax.random.uniform(k6, (output_size,), jnp.float32, -bound, bound)
    params["fc_w_t"] = w_fc.T            # (H, O)
    params["fc_b"] = b_fc                # (O,)
    return params


# ----------------------------------------------------------------------------
# Pure-JAX reference (for correctness check) — uses the raw, unscaled params.
# ----------------------------------------------------------------------------
def reference_forward(x_btf, params):
    h_seq = jnp.transpose(x_btf, (1, 0, 2))          # (T, B, F)
    for lp in params["layers"]:
        H = lp["whh_t"].shape[0]
        B = h_seq.shape[1]

        def step(carry, x_t, lp=lp, H=H):
            h_prev, c_prev = carry
            gates = x_t @ lp["wih_t"] + h_prev @ lp["whh_t"] + lp["bias"]
            i = jax.nn.sigmoid(gates[:, 0 * H:1 * H])
            f = jax.nn.sigmoid(gates[:, 1 * H:2 * H])
            g = jnp.tanh(gates[:, 2 * H:3 * H])
            o = jax.nn.sigmoid(gates[:, 3 * H:4 * H])
            c = f * c_prev + i * g
            h = o * jnp.tanh(c)
            return (h, c), h

        init = (jnp.zeros((B, H), jnp.float32), jnp.zeros((B, H), jnp.float32))
        _, h_seq = jax.lax.scan(step, init, h_seq)
    out = h_seq @ params["fc_w_t"] + params["fc_b"]
    return jnp.transpose(out, (1, 0, 2))             # (B, T, O)


# ----------------------------------------------------------------------------
if __name__ == "__main__":
    B, T = 2, 8
    INPUT_SIZE, HIDDEN_SIZE, NUM_LAYERS, OUTPUT_SIZE = 16, 32, 2, 4

    key = jax.random.PRNGKey(0)
    key, xk, pk = jax.random.split(key, 3)
    x = jax.random.normal(xk, (B, T, INPUT_SIZE), jnp.float32)
    params = init_params(pk, INPUT_SIZE, HIDDEN_SIZE, NUM_LAYERS, OUTPUT_SIZE)

    ref = jax.block_until_ready(reference_forward(x, params))

    # f32 MXU operands: tight agreement with the pure-JAX reference.
    packed_f32 = pack_params(params, compute_dtype=jnp.float32)
    out_f32 = jax.block_until_ready(lstm_model_forward(x, packed_f32))
    assert out_f32.shape == (B, T, OUTPUT_SIZE)
    assert jnp.max(jnp.abs(out_f32 - ref)) < 2e-4, "f32 mismatch vs reference"

    # Default fast path: bf16 MXU operands, f32 accumulation / gates / state.
    # NOTE: h is cast to bf16 only as a matmul operand; for very long T re-validate
    # drift or keep f32 weights on the recurrent matmul.
    packed_bf16 = pack_params(params)  # bfloat16 by default
    out_bf16 = jax.block_until_ready(lstm_model_forward(x, packed_bf16))
    assert out_bf16.shape == (B, T, OUTPUT_SIZE)
    assert jnp.max(jnp.abs(out_bf16 - ref)) < 5e-2, "bf16 mismatch vs reference"

    # Batch split across the "parallel" grid axis (uses both TensorCores on v7x).
    out_mc = jax.block_until_ready(
        lstm_model_forward(x, packed_bf16, batch_blocks=2))
    assert jnp.max(jnp.abs(out_mc - out_bf16)) < 1e-5, "batch-blocked mismatch"

    print("KERNEL_OK")
</pallas_src>

<mosaic_0001>
module attributes {stable_mosaic.version = 11 : i64} {
  func.func @_fused_lstm_kernel(%arg0: i32, %arg1: memref<2x8x16xf32, #tpu.memory_space<vmem>>, %arg2: memref<16x128xf32, #tpu.memory_space<vmem>>, %arg3: memref<32x128xf32, #tpu.memory_space<vmem>>, %arg4: memref<1x128xf32, #tpu.memory_space<vmem>>, %arg5: memref<32x128xf32, #tpu.memory_space<vmem>>, %arg6: memref<32x128xf32, #tpu.memory_space<vmem>>, %arg7: memref<1x128xf32, #tpu.memory_space<vmem>>, %arg8: memref<32x4xf32, #tpu.memory_space<vmem>>, %arg9: memref<1x4xf32, #tpu.memory_space<vmem>>, %arg10: memref<2x8x4xf32, #tpu.memory_space<vmem>>) attributes {dimension_semantics = [#tpu.dimension_semantics<parallel>], iteration_bounds = array<i64: 1>, scalar_prefetch = 0 : i64, scratch_operands = 0 : i64, tpu.core_type = #tpu.core_type<tc>, window_params = [{transform_indices = @transform_0, window_bounds = array<i64: 2, 8, 16>}, {pipeline_mode = #tpu.pipeline_mode<synchronous>, transform_indices = @transform_1, window_bounds = array<i64: 16, 128>}, {pipeline_mode = #tpu.pipeline_mode<synchronous>, transform_indices = @transform_2, window_bounds = array<i64: 32, 128>}, {pipeline_mode = #tpu.pipeline_mode<synchronous>, transform_indices = @transform_3, window_bounds = array<i64: 1, 128>}, {pipeline_mode = #tpu.pipeline_mode<synchronous>, transform_indices = @transform_4, window_bounds = array<i64: 32, 128>}, {pipeline_mode = #tpu.pipeline_mode<synchronous>, transform_indices = @transform_5, window_bounds = array<i64: 32, 128>}, {pipeline_mode = #tpu.pipeline_mode<synchronous>, transform_indices = @transform_6, window_bounds = array<i64: 1, 128>}, {pipeline_mode = #tpu.pipeline_mode<synchronous>, transform_indices = @transform_7, window_bounds = array<i64: 32, 4>}, {pipeline_mode = #tpu.pipeline_mode<synchronous>, transform_indices = @transform_8, window_bounds = array<i64: 1, 4>}, {transform_indices = @transform_9, window_bounds = array<i64: 2, 8, 4>}]} {
    %c0 = arith.constant 0 : index
    %c0_0 = arith.constant 0 : index
    %c0_1 = arith.constant 0 : index
    %0 = vector.load %arg1[%c0, %c0_0, %c0_1] : memref<2x8x16xf32, #tpu.memory_space<vmem>>, vector<2x8x16xf32>
    %1 = vector.shape_cast %0 : vector<2x8x16xf32> to vector<16x16xf32>
    %2 = tpu.iota {dimensions = array<i32: 1>} : vector<2x8x32xi32>
    %c0_2 = arith.constant 0 : index
    %c0_3 = arith.constant 0 : index
    %3 = vector.load %arg2[%c0_2, %c0_3] : memref<16x128xf32, #tpu.memory_space<vmem>>, vector<16x128xf32>
    %cst = arith.constant dense<0.000000e+00> : vector<16x128xf32>
    %4 = tpu.matmul %1, %3, %cst {dimension_numbers = #tpu.dot_dimension_numbers<[1], [0], [0], [1], [0, 0, 1, 1], [], []>} : vector<16x16xf32>, vector<16x128xf32>, vector<16x128xf32> -> vector<16x128xf32>
    %c0_4 = arith.constant 0 : index
    %c0_5 = arith.constant 0 : index
    %5 = vector.load %arg4[%c0_4, %c0_5] : memref<1x128xf32, #tpu.memory_space<vmem>>, vector<1x128xf32>
    %6 = vector.broadcast %5 : vector<1x128xf32> to vector<16x128xf32>
    %7 = arith.addf %4, %6 : vector<16x128xf32>
    %8 = vector.shape_cast %7 : vector<16x128xf32> to vector<2x8x128xf32>
    %9 = vector.extract_strided_slice %8 {offsets = [0, 0, 0], sizes = [2, 1, 128], strides = [1, 1, 1]} : vector<2x8x128xf32> to vector<2x1x128xf32>
    %10 = vector.shape_cast %9 : vector<2x1x128xf32> to vector<2x128xf32>
    %11 = vector.extract_strided_slice %8 {offsets = [0, 1, 0], sizes = [2, 1, 128], strides = [1, 1, 1]} : vector<2x8x128xf32> to vector<2x1x128xf32>
    %12 = vector.shape_cast %11 : vector<2x1x128xf32> to vector<2x128xf32>
    %13 = vector.extract_strided_slice %8 {offsets = [0, 2, 0], sizes = [2, 1, 128], strides = [1, 1, 1]} : vector<2x8x128xf32> to vector<2x1x128xf32>
    %14 = vector.shape_cast %13 : vector<2x1x128xf32> to vector<2x128xf32>
    %15 = vector.extract_strided_slice %8 {offsets = [0, 3, 0], sizes = [2, 1, 128], strides = [1, 1, 1]} : vector<2x8x128xf32> to vector<2x1x128xf32>
    %16 = vector.shape_cast %15 : vector<2x1x128xf32> to vector<2x128xf32>
    %17 = vector.extract_strided_slice %8 {offsets = [0, 4, 0], sizes = [2, 1, 128], strides = [1, 1, 1]} : vector<2x8x128xf32> to vector<2x1x128xf32>
    %18 = vector.shape_cast %17 : vector<2x1x128xf32> to vector<2x128xf32>
    %19 = vector.extract_strided_slice %8 {offsets = [0, 5, 0], sizes = [2, 1, 128], strides = [1, 1, 1]} : vector<2x8x128xf32> to vector<2x1x128xf32>
    %20 = vector.shape_cast %19 : vector<2x1x128xf32> to vector<2x128xf32>
    %21 = vector.extract_strided_slice %8 {offsets = [0, 6, 0], sizes = [2, 1, 128], strides = [1, 1, 1]} : vector<2x8x128xf32> to vector<2x1x128xf32>
    %22 = vector.shape_cast %21 : vector<2x1x128xf32> to vector<2x128xf32>
    %23 = vector.extract_strided_slice %8 {offsets = [0, 7, 0], sizes = [2, 1, 128], strides = [1, 1, 1]} : vector<2x8x128xf32> to vector<2x1x128xf32>
    %24 = vector.shape_cast %23 : vector<2x1x128xf32> to vector<2x128xf32>
    %c0_6 = arith.constant 0 : index
    %c0_7 = arith.constant 0 : index
    %25 = vector.load %arg3[%c0_6, %c0_7] : memref<32x128xf32, #tpu.memory_space<vmem>>, vector<32x128xf32>
    %cst_8 = arith.constant 0.000000e+00 : f32
    %26 = vector.broadcast %cst_8 : f32 to vector<2x32xf32>
    %cst_9 = arith.constant 0.000000e+00 : f32
    %27 = vector.broadcast %cst_9 : f32 to vector<2x32xf32>
    %cst_10 = arith.constant dense<0.000000e+00> : vector<2x128xf32>
    %28 = tpu.matmul %26, %25, %cst_10 {dimension_numbers = #tpu.dot_dimension_numbers<[1], [0], [0], [1], [0, 0, 1, 1], [], []>} : vector<2x32xf32>, vector<32x128xf32>, vector<2x128xf32> -> vector<2x128xf32>
    %29 = arith.addf %10, %28 : vector<2x128xf32>
    %30 = arith.negf %29 : vector<2x128xf32>
    %31 = math.exp %30 : vector<2x128xf32>
    %cst_11 = arith.constant 1.000000e+00 : f32
    %32 = vector.broadcast %cst_11 : f32 to vector<2x128xf32>
    %33 = arith.addf %32, %31 : vector<2x128xf32>
    %34 = arith.divf %32, %33 : vector<2x128xf32>
    %35 = vector.extract_strided_slice %34 {offsets = [0, 0], sizes = [2, 32], strides = [1, 1]} : vector<2x128xf32> to vector<2x32xf32>
    %36 = vector.extract_strided_slice %34 {offsets = [0, 32], sizes = [2, 32], strides = [1, 1]} : vector<2x128xf32> to vector<2x32xf32>
    %37 = vector.extract_strided_slice %34 {offsets = [0, 64], sizes = [2, 32], strides = [1, 1]} : vector<2x128xf32> to vector<2x32xf32>
    %cst_12 = arith.constant 2.000000e+00 : f32
    %38 = vector.broadcast %cst_12 : f32 to vector<2x32xf32>
    %39 = arith.mulf %38, %37 : vector<2x32xf32>
    %cst_13 = arith.constant 1.000000e+00 : f32
    %40 = vector.broadcast %cst_13 : f32 to vector<2x32xf32>
    %41 = arith.subf %39, %40 : vector<2x32xf32>
    %42 = vector.extract_strided_slice %34 {offsets = [0, 96], sizes = [2, 32], strides = [1, 1]} : vector<2x128xf32> to vector<2x32xf32>
    %43 = arith.mulf %36, %27 : vector<2x32xf32>
    %44 = arith.mulf %35, %41 : vector<2x32xf32>
    %45 = arith.addf %43, %44 : vector<2x32xf32>
    %46 = math.tanh %45 : vector<2x32xf32>
    %47 = arith.mulf %42, %46 : vector<2x32xf32>
    %cst_14 = arith.constant dense<0.000000e+00> : vector<2x128xf32>
    %48 = tpu.matmul %47, %25, %cst_14 {dimension_numbers = #tpu.dot_dimension_numbers<[1], [0], [0], [1], [0, 0, 1, 1], [], []>} : vector<2x32xf32>, vector<32x128xf32>, vector<2x128xf32> -> vector<2x128xf32>
    %49 = arith.addf %12, %48 : vector<2x128xf32>
    %50 = arith.negf %49 : vector<2x128xf32>
    %51 = math.exp %50 : vector<2x128xf32>
    %cst_15 = arith.constant 1.000000e+00 : f32
    %52 = vector.broadcast %cst_15 : f32 to vector<2x128xf32>
    %53 = arith.addf %52, %51 : vector<2x128xf32>
    %54 = arith.divf %52, %53 : vector<2x128xf32>
    %55 = vector.extract_strided_slice %54 {offsets = [0, 0], sizes = [2, 32], strides = [1, 1]} : vector<2x128xf32> to vector<2x32xf32>
    %56 = vector.extract_strided_slice %54 {offsets = [0, 32], sizes = [2, 32], strides = [1, 1]} : vector<2x128xf32> to vector<2x32xf32>
    %57 = vector.extract_strided_slice %54 {offsets = [0, 64], sizes = [2, 32], strides = [1, 1]} : vector<2x128xf32> to vector<2x32xf32>
    %cst_16 = arith.constant 2.000000e+00 : f32
    %58 = vector.broadcast %cst_16 : f32 to vector<2x32xf32>
    %59 = arith.mulf %58, %57 : vector<2x32xf32>
    %cst_17 = arith.constant 1.000000e+00 : f32
    %60 = vector.broadcast %cst_17 : f32 to vector<2x32xf32>
    %61 = arith.subf %59, %60 : vector<2x32xf32>
    %62 = vector.extract_strided_slice %54 {offsets = [0, 96], sizes = [2, 32], strides = [1, 1]} : vector<2x128xf32> to vector<2x32xf32>
    %63 = arith.mulf %56, %45 : vector<2x32xf32>
    %64 = arith.mulf %55, %61 : vector<2x32xf32>
    %65 = arith.addf %63, %64 : vector<2x32xf32>
    %66 = math.tanh %65 : vector<2x32xf32>
    %67 = arith.mulf %62, %66 : vector<2x32xf32>
    %cst_18 = arith.constant dense<0.000000e+00> : vector<2x128xf32>
    %68 = tpu.matmul %67, %25, %cst_18 {dimension_numbers = #tpu.dot_dimension_numbers<[1], [0], [0], [1], [0, 0, 1, 1], [], []>} : vector<2x32xf32>, vector<32x128xf32>, vector<2x128xf32> -> vector<2x128xf32>
    %69 = arith.addf %14, %68 : vector<2x128xf32>
    %70 = arith.negf %69 : vector<2x128xf32>
    %71 = math.exp %70 : vector<2x128xf32>
    %cst_19 = arith.constant 1.000000e+00 : f32
    %72 = vector.broadcast %cst_19 : f32 to vector<2x128xf32>
    %73 = arith.addf %72, %71 : vector<2x128xf32>
    %74 = arith.divf %72, %73 : vector<2x128xf32>
    %75 = vector.extract_strided_slice %74 {offsets = [0, 0], sizes = [2, 32], strides = [1, 1]} : vector<2x128xf32> to vector<2x32xf32>
    %76 = vector.extract_strided_slice %74 {offsets = [0, 32], sizes = [2, 32], strides = [1, 1]} : vector<2x128xf32> to vector<2x32xf32>
    %77 = vector.extract_strided_slice %74 {offsets = [0, 64], sizes = [2, 32], strides = [1, 1]} : vector<2x128xf32> to vector<2x32xf32>
    %cst_20 = arith.constant 2.000000e+00 : f32
    %78 = vector.broadcast %cst_20 : f32 to vector<2x32xf32>
    %79 = arith.mulf %78, %77 : vector<2x32xf32>
    %cst_21 = arith.constant 1.000000e+00 : f32
    %80 = vector.broadcast %cst_21 : f32 to vector<2x32xf32>
    %81 = arith.subf %79, %80 : vector<2x32xf32>
    %82 = vector.extract_strided_slice %74 {offsets = [0, 96], sizes = [2, 32], strides = [1, 1]} : vector<2x128xf32> to vector<2x32xf32>
    %83 = arith.mulf %76, %65 : vector<2x32xf32>
    %84 = arith.mulf %75, %81 : vector<2x32xf32>
    %85 = arith.addf %83, %84 : vector<2x32xf32>
    %86 = math.tanh %85 : vector<2x32xf32>
    %87 = arith.mulf %82, %86 : vector<2x32xf32>
    %cst_22 = arith.constant dense<0.000000e+00> : vector<2x128xf32>
    %88 = tpu.matmul %87, %25, %cst_22 {dimension_numbers = #tpu.dot_dimension_numbers<[1], [0], [0], [1], [0, 0, 1, 1], [], []>} : vector<2x32xf32>, vector<32x128xf32>, vector<2x128xf32> -> vector<2x128xf32>
    %89 = arith.addf %16, %88 : vector<2x128xf32>
    %90 = arith.negf %89 : vector<2x128xf32>
    %91 = math.exp %90 : vector<2x128xf32>
    %cst_23 = arith.constant 1.000000e+00 : f32
    %92 = vector.broadcast %cst_23 : f32 to vector<2x128xf32>
    %93 = arith.addf %92, %91 : vector<2x128xf32>
    %94 = arith.divf %92, %93 : vector<2x128xf32>
    %95 = vector.extract_strided_slice %94 {offsets = [0, 0], sizes = [2, 32], strides = [1, 1]} : vector<2x128xf32> to vector<2x32xf32>
    %96 = vector.extract_strided_slice %94 {offsets = [0, 32], sizes = [2, 32], strides = [1, 1]} : vector<2x128xf32> to vector<2x32xf32>
    %97 = vector.extract_strided_slice %94 {offsets = [0, 64], sizes = [2, 32], strides = [1, 1]} : vector<2x128xf32> to vector<2x32xf32>
    %cst_24 = arith.constant 2.000000e+00 : f32
    %98 = vector.broadcast %cst_24 : f32 to vector<2x32xf32>
    %99 = arith.mulf %98, %97 : vector<2x32xf32>
    %cst_25 = arith.constant 1.000000e+00 : f32
    %100 = vector.broadcast %cst_25 : f32 to vector<2x32xf32>
    %101 = arith.subf %99, %100 : vector<2x32xf32>
    %102 = vector.extract_strided_slice %94 {offsets = [0, 96], sizes = [2, 32], strides = [1, 1]} : vector<2x128xf32> to vector<2x32xf32>
    %103 = arith.mulf %96, %85 : vector<2x32xf32>
    %104 = arith.mulf %95, %101 : vector<2x32xf32>
    %105 = arith.addf %103, %104 : vector<2x32xf32>
    %106 = math.tanh %105 : vector<2x32xf32>
    %107 = arith.mulf %102, %106 : vector<2x32xf32>
    %cst_26 = arith.constant dense<0.000000e+00> : vector<2x128xf32>
    %108 = tpu.matmul %107, %25, %cst_26 {dimension_numbers = #tpu.dot_dimension_numbers<[1], [0], [0], [1], [0, 0, 1, 1], [], []>} : vector<2x32xf32>, vector<32x128xf32>, vector<2x128xf32> -> vector<2x128xf32>
    %109 = arith.addf %18, %108 : vector<2x128xf32>
    %110 = arith.negf %109 : vector<2x128xf32>
    %111 = math.exp %110 : vector<2x128xf32>
    %cst_27 = arith.constant 1.000000e+00 : f32
    %112 = vector.broadcast %cst_27 : f32 to vector<2x128xf32>
    %113 = arith.addf %112, %111 : vector<2x128xf32>
    %114 = arith.divf %112, %113 : vector<2x128xf32>
    %115 = vector.extract_strided_slice %114 {offsets = [0, 0], sizes = [2, 32], strides = [1, 1]} : vector<2x128xf32> to vector<2x32xf32>
    %116 = vector.extract_strided_slice %114 {offsets = [0, 32], sizes = [2, 32], strides = [1, 1]} : vector<2x128xf32> to vector<2x32xf32>
    %117 = vector.extract_strided_slice %114 {offsets = [0, 64], sizes = [2, 32], strides = [1, 1]} : vector<2x128xf32> to vector<2x32xf32>
    %cst_28 = arith.constant 2.000000e+00 : f32
    %118 = vector.broadcast %cst_28 : f32 to vector<2x32xf32>
    %119 = arith.mulf %118, %117 : vector<2x32xf32>
    %cst_29 = arith.constant 1.000000e+00 : f32
    %120 = vector.broadcast %cst_29 : f32 to vector<2x32xf32>
    %121 = arith.subf %119, %120 : vector<2x32xf32>
    %122 = vector.extract_strided_slice %114 {offsets = [0, 96], sizes = [2, 32], strides = [1, 1]} : vector<2x128xf32> to vector<2x32xf32>
    %123 = arith.mulf %116, %105 : vector<2x32xf32>
    %124 = arith.mulf %115, %121 : vector<2x32xf32>
    %125 = arith.addf %123, %124 : vector<2x32xf32>
    %126 = math.tanh %125 : vector<2x32xf32>
    %127 = arith.mulf %122, %126 : vector<2x32xf32>
    %cst_30 = arith.constant dense<0.000000e+00> : vector<2x128xf32>
    %128 = tpu.matmul %127, %25, %cst_30 {dimension_numbers = #tpu.dot_dimension_numbers<[1], [0], [0], [1], [0, 0, 1, 1], [], []>} : vector<2x32xf32>, vector<32x128xf32>, vector<2x128xf32> -> vector<2x128xf32>
    %129 = arith.addf %20, %128 : vector<2x128xf32>
    %130 = arith.negf %129 : vector<2x128xf32>
    %131 = math.exp %130 : vector<2x128xf32>
    %cst_31 = arith.constant 1.000000e+00 : f32
    %132 = vector.broadcast %cst_31 : f32 to vector<2x128xf32>
    %133 = arith.addf %132, %131 : vector<2x128xf32>
    %134 = arith.divf %132, %133 : vector<2x128xf32>
    %135 = vector.extract_strided_slice %134 {offsets = [0, 0], sizes = [2, 32], strides = [1, 1]} : vector<2x128xf32> to vector<2x32xf32>
    %136 = vector.extract_strided_slice %134 {offsets = [0, 32], sizes = [2, 32], strides = [1, 1]} : vector<2x128xf32> to vector<2x32xf32>
    %137 = vector.extract_strided_slice %134 {offsets = [0, 64], sizes = [2, 32], strides = [1, 1]} : vector<2x128xf32> to vector<2x32xf32>
    %cst_32 = arith.constant 2.000000e+00 : f32
    %138 = vector.broadcast %cst_32 : f32 to vector<2x32xf32>
    %139 = arith.mulf %138, %137 : vector<2x32xf32>
    %cst_33 = arith.constant 1.000000e+00 : f32
    %140 = vector.broadcast %cst_33 : f32 to vector<2x32xf32>
    %141 = arith.subf %139, %140 : vector<2x32xf32>
    %142 = vector.extract_strided_slice %134 {offsets = [0, 96], sizes = [2, 32], strides = [1, 1]} : vector<2x128xf32> to vector<2x32xf32>
    %143 = arith.mulf %136, %125 : vector<2x32xf32>
    %144 = arith.mulf %135, %141 : vector<2x32xf32>
    %145 = arith.addf %143, %144 : vector<2x32xf32>
    %146 = math.tanh %145 : vector<2x32xf32>
    %147 = arith.mulf %142, %146 : vector<2x32xf32>
    %cst_34 = arith.constant dense<0.000000e+00> : vector<2x128xf32>
    %148 = tpu.matmul %147, %25, %cst_34 {dimension_numbers = #tpu.dot_dimension_numbers<[1], [0], [0], [1], [0, 0, 1, 1], [], []>} : vector<2x32xf32>, vector<32x128xf32>, vector<2x128xf32> -> vector<2x128xf32>
    %149 = arith.addf %22, %148 : vector<2x128xf32>
    %150 = arith.negf %149 : vector<2x128xf32>
    %151 = math.exp %150 : vector<2x128xf32>
    %cst_35 = arith.constant 1.000000e+00 : f32
    %152 = vector.broadcast %cst_35 : f32 to vector<2x128xf32>
    %153 = arith.addf %152, %151 : vector<2x128xf32>
    %154 = arith.divf %152, %153 : vector<2x128xf32>
    %155 = vector.extract_strided_slice %154 {offsets = [0, 0], sizes = [2, 32], strides = [1, 1]} : vector<2x128xf32> to vector<2x32xf32>
    %156 = vector.extract_strided_slice %154 {offsets = [0, 32], sizes = [2, 32], strides = [1, 1]} : vector<2x128xf32> to vector<2x32xf32>
    %157 = vector.extract_strided_slice %154 {offsets = [0, 64], sizes = [2, 32], strides = [1, 1]} : vector<2x128xf32> to vector<2x32xf32>
    %cst_36 = arith.constant 2.000000e+00 : f32
    %158 = vector.broadcast %cst_36 : f32 to vector<2x32xf32>
    %159 = arith.mulf %158, %157 : vector<2x32xf32>
    %cst_37 = arith.constant 1.000000e+00 : f32
    %160 = vector.broadcast %cst_37 : f32 to vector<2x32xf32>
    %161 = arith.subf %159, %160 : vector<2x32xf32>
    %162 = vector.extract_strided_slice %154 {offsets = [0, 96], sizes = [2, 32], strides = [1, 1]} : vector<2x128xf32> to vector<2x32xf32>
    %163 = arith.mulf %156, %145 : vector<2x32xf32>
    %164 = arith.mulf %155, %161 : vector<2x32xf32>
    %165 = arith.addf %163, %164 : vector<2x32xf32>
    %166 = math.tanh %165 : vector<2x32xf32>
    %167 = arith.mulf %162, %166 : vector<2x32xf32>
    %cst_38 = arith.constant dense<0.000000e+00> : vector<2x128xf32>
    %168 = tpu.matmul %167, %25, %cst_38 {dimension_numbers = #tpu.dot_dimension_numbers<[1], [0], [0], [1], [0, 0, 1, 1], [], []>} : vector<2x32xf32>, vector<32x128xf32>, vector<2x128xf32> -> vector<2x128xf32>
    %169 = arith.addf %24, %168 : vector<2x128xf32>
    %170 = arith.negf %169 : vector<2x128xf32>
    %171 = math.exp %170 : vector<2x128xf32>
    %cst_39 = arith.constant 1.000000e+00 : f32
    %172 = vector.broadcast %cst_39 : f32 to vector<2x128xf32>
    %173 = arith.addf %172, %171 : vector<2x128xf32>
    %174 = arith.divf %172, %173 : vector<2x128xf32>
    %175 = vector.extract_strided_slice %174 {offsets = [0, 0], sizes = [2, 32], strides = [1, 1]} : vector<2x128xf32> to vector<2x32xf32>
    %176 = vector.extract_strided_slice %174 {offsets = [0, 32], sizes = [2, 32], strides = [1, 1]} : vector<2x128xf32> to vector<2x32xf32>
    %177 = vector.extract_strided_slice %174 {offsets = [0, 64], sizes = [2, 32], strides = [1, 1]} : vector<2x128xf32> to vector<2x32xf32>
    %cst_40 = arith.constant 2.000000e+00 : f32
    %178 = vector.broadcast %cst_40 : f32 to vector<2x32xf32>
    %179 = arith.mulf %178, %177 : vector<2x32xf32>
    %cst_41 = arith.constant 1.000000e+00 : f32
    %180 = vector.broadcast %cst_41 : f32 to vector<2x32xf32>
    %181 = arith.subf %179, %180 : vector<2x32xf32>
    %182 = vector.extract_strided_slice %174 {offsets = [0, 96], sizes = [2, 32], strides = [1, 1]} : vector<2x128xf32> to vector<2x32xf32>
    %183 = arith.mulf %176, %165 : vector<2x32xf32>
    %184 = arith.mulf %175, %181 : vector<2x32xf32>
    %185 = arith.addf %183, %184 : vector<2x32xf32>
    %186 = math.tanh %185 : vector<2x32xf32>
    %187 = arith.mulf %182, %186 : vector<2x32xf32>
    %cst_42 = arith.constant 0.000000e+00 : f32
    %188 = vector.broadcast %cst_42 : f32 to vector<2x8x32xf32>
    %c0_i32 = arith.constant 0 : i32
    %189 = vector.broadcast %c0_i32 : i32 to vector<2x8x32xi32>
    %190 = arith.cmpi eq, %2, %189 : vector<2x8x32xi32>
    %191 = vector.shape_cast %47 : vector<2x32xf32> to vector<2x1x32xf32>
    %192 = vector.shape_cast %191 : vector<2x1x32xf32> to vector<2x1x32xf32>
    %193 = vector.broadcast %192 : vector<2x1x32xf32> to vector<2x8x32xf32>
    %194 = arith.select %190, %193, %188 : vector<2x8x32xi1>, vector<2x8x32xf32>
    %c1_i32 = arith.constant 1 : i32
    %195 = vector.broadcast %c1_i32 : i32 to vector<2x8x32xi32>
    %196 = arith.cmpi eq, %2, %195 : vector<2x8x32xi32>
    %197 = vector.shape_cast %67 : vector<2x32xf32> to vector<2x1x32xf32>
    %198 = vector.shape_cast %197 : vector<2x1x32xf32> to vector<2x1x32xf32>
    %199 = vector.broadcast %198 : vector<2x1x32xf32> to vector<2x8x32xf32>
    %200 = arith.select %196, %199, %194 : vector<2x8x32xi1>, vector<2x8x32xf32>
    %c2_i32 = arith.constant 2 : i32
    %201 = vector.broadcast %c2_i32 : i32 to vector<2x8x32xi32>
    %202 = arith.cmpi eq, %2, %201 : vector<2x8x32xi32>
    %203 = vector.shape_cast %87 : vector<2x32xf32> to vector<2x1x32xf32>
    %204 = vector.shape_cast %203 : vector<2x1x32xf32> to vector<2x1x32xf32>
    %205 = vector.broadcast %204 : vector<2x1x32xf32> to vector<2x8x32xf32>
    %206 = arith.select %202, %205, %200 : vector<2x8x32xi1>, vector<2x8x32xf32>
    %c3_i32 = arith.constant 3 : i32
    %207 = vector.broadcast %c3_i32 : i32 to vector<2x8x32xi32>
    %208 = arith.cmpi eq, %2, %207 : vector<2x8x32xi32>
    %209 = vector.shape_cast %107 : vector<2x32xf32> to vector<2x1x32xf32>
    %210 = vector.shape_cast %209 : vector<2x1x32xf32> to vector<2x1x32xf32>
    %211 = vector.broadcast %210 : vector<2x1x32xf32> to vector<2x8x32xf32>
    %212 = arith.select %208, %211, %206 : vector<2x8x32xi1>, vector<2x8x32xf32>
    %c4_i32 = arith.constant 4 : i32
    %213 = vector.broadcast %c4_i32 : i32 to vector<2x8x32xi32>
    %214 = arith.cmpi eq, %2, %213 : vector<2x8x32xi32>
    %215 = vector.shape_cast %127 : vector<2x32xf32> to vector<2x1x32xf32>
    %216 = vector.shape_cast %215 : vector<2x1x32xf32> to vector<2x1x32xf32>
    %217 = vector.broadcast %216 : vector<2x1x32xf32> to vector<2x8x32xf32>
    %218 = arith.select %214, %217, %212 : vector<2x8x32xi1>, vector<2x8x32xf32>
    %c5_i32 = arith.constant 5 : i32
    %219 = vector.broadcast %c5_i32 : i32 to vector<2x8x32xi32>
    %220 = arith.cmpi eq, %2, %219 : vector<2x8x32xi32>
    %221 = vector.shape_cast %147 : vector<2x32xf32> to vector<2x1x32xf32>
    %222 = vector.shape_cast %221 : vector<2x1x32xf32> to vector<2x1x32xf32>
    %223 = vector.broadcast %222 : vector<2x1x32xf32> to vector<2x8x32xf32>
    %224 = arith.select %220, %223, %218 : vector<2x8x32xi1>, vector<2x8x32xf32>
    %c6_i32 = arith.constant 6 : i32
    %225 = vector.broadcast %c6_i32 : i32 to vector<2x8x32xi32>
    %226 = arith.cmpi eq, %2, %225 : vector<2x8x32xi32>
    %227 = vector.shape_cast %167 : vector<2x32xf32> to vector<2x1x32xf32>
    %228 = vector.shape_cast %227 : vector<2x1x32xf32> to vector<2x1x32xf32>
    %229 = vector.broadcast %228 : vector<2x1x32xf32> to vector<2x8x32xf32>
    %230 = arith.select %226, %229, %224 : vector<2x8x32xi1>, vector<2x8x32xf32>
    %c7_i32 = arith.constant 7 : i32
    %231 = vector.broadcast %c7_i32 : i32 to vector<2x8x32xi32>
    %232 = arith.cmpi eq, %2, %231 : vector<2x8x32xi32>
    %233 = vector.shape_cast %187 : vector<2x32xf32> to vector<2x1x32xf32>
    %234 = vector.shape_cast %233 : vector<2x1x32xf32> to vector<2x1x32xf32>
    %235 = vector.broadcast %234 : vector<2x1x32xf32> to vector<2x8x32xf32>
    %236 = arith.select %232, %235, %230 : vector<2x8x32xi1>, vector<2x8x32xf32>
    %237 = vector.shape_cast %236 : vector<2x8x32xf32> to vector<16x32xf32>
    %c0_43 = arith.constant 0 : index
    %c0_44 = arith.constant 0 : index
    %238 = vector.load %arg5[%c0_43, %c0_44] : memref<32x128xf32, #tpu.memory_space<vmem>>, vector<32x128xf32>
    %cst_45 = arith.constant dense<0.000000e+00> : vector<16x128xf32>
    %239 = tpu.matmul %237, %238, %cst_45 {dimension_numbers = #tpu.dot_dimension_numbers<[1], [0], [0], [1], [0, 0, 1, 1], [], []>} : vector<16x32xf32>, vector<32x128xf32>, vector<16x128xf32> -> vector<16x128xf32>
    %c0_46 = arith.constant 0 : index
    %c0_47 = arith.constant 0 : index
    %240 = vector.load %arg7[%c0_46, %c0_47] : memref<1x128xf32, #tpu.memory_space<vmem>>, vector<1x128xf32>
    %241 = vector.broadcast %240 : vector<1x128xf32> to vector<16x128xf32>
    %242 = arith.addf %239, %241 : vector<16x128xf32>
    %243 = vector.shape_cast %242 : vector<16x128xf32> to vector<2x8x128xf32>
    %244 = vector.extract_strided_slice %243 {offsets = [0, 0, 0], sizes = [2, 1, 128], strides = [1, 1, 1]} : vector<2x8x128xf32> to vector<2x1x128xf32>
    %245 = vector.shape_cast %244 : vector<2x1x128xf32> to vector<2x128xf32>
    %246 = vector.extract_strided_slice %243 {offsets = [0, 1, 0], sizes = [2, 1, 128], strides = [1, 1, 1]} : vector<2x8x128xf32> to vector<2x1x128xf32>
    %247 = vector.shape_cast %246 : vector<2x1x128xf32> to vector<2x128xf32>
    %248 = vector.extract_strided_slice %243 {offsets = [0, 2, 0], sizes = [2, 1, 128], strides = [1, 1, 1]} : vector<2x8x128xf32> to vector<2x1x128xf32>
    %249 = vector.shape_cast %248 : vector<2x1x128xf32> to vector<2x128xf32>
    %250 = vector.extract_strided_slice %243 {offsets = [0, 3, 0], sizes = [2, 1, 128], strides = [1, 1, 1]} : vector<2x8x128xf32> to vector<2x1x128xf32>
    %251 = vector.shape_cast %250 : vector<2x1x128xf32> to vector<2x128xf32>
    %252 = vector.extract_strided_slice %243 {offsets = [0, 4, 0], sizes = [2, 1, 128], strides = [1, 1, 1]} : vector<2x8x128xf32> to vector<2x1x128xf32>
    %253 = vector.shape_cast %252 : vector<2x1x128xf32> to vector<2x128xf32>
    %254 = vector.extract_strided_slice %243 {offsets = [0, 5, 0], sizes = [2, 1, 128], strides = [1, 1, 1]} : vector<2x8x128xf32> to vector<2x1x128xf32>
    %255 = vector.shape_cast %254 : vector<2x1x128xf32> to vector<2x128xf32>
    %256 = vector.extract_strided_slice %243 {offsets = [0, 6, 0], sizes = [2, 1, 128], strides = [1, 1, 1]} : vector<2x8x128xf32> to vector<2x1x128xf32>
    %257 = vector.shape_cast %256 : vector<2x1x128xf32> to vector<2x128xf32>
    %258 = vector.extract_strided_slice %243 {offsets = [0, 7, 0], sizes = [2, 1, 128], strides = [1, 1, 1]} : vector<2x8x128xf32> to vector<2x1x128xf32>
    %259 = vector.shape_cast %258 : vector<2x1x128xf32> to vector<2x128xf32>
    %c0_48 = arith.constant 0 : index
    %c0_49 = arith.constant 0 : index
    %260 = vector.load %arg6[%c0_48, %c0_49] : memref<32x128xf32, #tpu.memory_space<vmem>>, vector<32x128xf32>
    %cst_50 = arith.constant 0.000000e+00 : f32
    %261 = vector.broadcast %cst_50 : f32 to vector<2x32xf32>
    %cst_51 = arith.constant 0.000000e+00 : f32
    %262 = vector.broadcast %cst_51 : f32 to vector<2x32xf32>
    %cst_52 = arith.constant dense<0.000000e+00> : vector<2x128xf32>
    %263 = tpu.matmul %261, %260, %cst_52 {dimension_numbers = #tpu.dot_dimension_numbers<[1], [0], [0], [1], [0, 0, 1, 1], [], []>} : vector<2x32xf32>, vector<32x128xf32>, vector<2x128xf32> -> vector<2x128xf32>
    %264 = arith.addf %245, %263 : vector<2x128xf32>
    %265 = arith.negf %264 : vector<2x128xf32>
    %266 = math.exp %265 : vector<2x128xf32>
    %cst_53 = arith.constant 1.000000e+00 : f32
    %267 = vector.broadcast %cst_53 : f32 to vector<2x128xf32>
    %268 = arith.addf %267, %266 : vector<2x128xf32>
    %269 = arith.divf %267, %268 : vector<2x128xf32>
    %270 = vector.extract_strided_slice %269 {offsets = [0, 0], sizes = [2, 32], strides = [1, 1]} : vector<2x128xf32> to vector<2x32xf32>
    %271 = vector.extract_strided_slice %269 {offsets = [0, 32], sizes = [2, 32], strides = [1, 1]} : vector<2x128xf32> to vector<2x32xf32>
    %272 = vector.extract_strided_slice %269 {offsets = [0, 64], sizes = [2, 32], strides = [1, 1]} : vector<2x128xf32> to vector<2x32xf32>
    %cst_54 = arith.constant 2.000000e+00 : f32
    %273 = vector.broadcast %cst_54 : f32 to vector<2x32xf32>
    %274 = arith.mulf %273, %272 : vector<2x32xf32>
    %cst_55 = arith.constant 1.000000e+00 : f32
    %275 = vector.broadcast %cst_55 : f32 to vector<2x32xf32>
    %276 = arith.subf %274, %275 : vector<2x32xf32>
    %277 = vector.extract_strided_slice %269 {offsets = [0, 96], sizes = [2, 32], strides = [1, 1]} : vector<2x128xf32> to vector<2x32xf32>
    %278 = arith.mulf %271, %262 : vector<2x32xf32>
    %279 = arith.mulf %270, %276 : vector<2x32xf32>
    %280 = arith.addf %278, %279 : vector<2x32xf32>
    %281 = math.tanh %280 : vector<2x32xf32>
    %282 = arith.mulf %277, %281 : vector<2x32xf32>
    %cst_56 = arith.constant dense<0.000000e+00> : vector<2x128xf32>
    %283 = tpu.matmul %282, %260, %cst_56 {dimension_numbers = #tpu.dot_dimension_numbers<[1], [0], [0], [1], [0, 0, 1, 1], [], []>} : vector<2x32xf32>, vector<32x128xf32>, vector<2x128xf32> -> vector<2x128xf32>
    %284 = arith.addf %247, %283 : vector<2x128xf32>
    %285 = arith.negf %284 : vector<2x128xf32>
    %286 = math.exp %285 : vector<2x128xf32>
    %cst_57 = arith.constant 1.000000e+00 : f32
    %287 = vector.broadcast %cst_57 : f32 to vector<2x128xf32>
    %288 = arith.addf %287, %286 : vector<2x128xf32>
    %289 = arith.divf %287, %288 : vector<2x128xf32>
    %290 = vector.extract_strided_slice %289 {offsets = [0, 0], sizes = [2, 32], strides = [1, 1]} : vector<2x128xf32> to vector<2x32xf32>
    %291 = vector.extract_strided_slice %289 {offsets = [0, 32], sizes = [2, 32], strides = [1, 1]} : vector<2x128xf32> to vector<2x32xf32>
    %292 = vector.extract_strided_slice %289 {offsets = [0, 64], sizes = [2, 32], strides = [1, 1]} : vector<2x128xf32> to vector<2x32xf32>
    %cst_58 = arith.constant 2.000000e+00 : f32
    %293 = vector.broadcast %cst_58 : f32 to vector<2x32xf32>
    %294 = arith.mulf %293, %292 : vector<2x32xf32>
    %cst_59 = arith.constant 1.000000e+00 : f32
    %295 = vector.broadcast %cst_59 : f32 to vector<2x32xf32>
    %296 = arith.subf %294, %295 : vector<2x32xf32>
    %297 = vector.extract_strided_slice %289 {offsets = [0, 96], sizes = [2, 32], strides = [1, 1]} : vector<2x128xf32> to vector<2x32xf32>
    %298 = arith.mulf %291, %280 : vector<2x32xf32>
    %299 = arith.mulf %290, %296 : vector<2x32xf32>
    %300 = arith.addf %298, %299 : vector<2x32xf32>
    %301 = math.tanh %300 : vector<2x32xf32>
    %302 = arith.mulf %297, %301 : vector<2x32xf32>
    %cst_60 = arith.constant dense<0.000000e+00> : vector<2x128xf32>
    %303 = tpu.matmul %302, %260, %cst_60 {dimension_numbers = #tpu.dot_dimension_numbers<[1], [0], [0], [1], [0, 0, 1, 1], [], []>} : vector<2x32xf32>, vector<32x128xf32>, vector<2x128xf32> -> vector<2x128xf32>
    %304 = arith.addf %249, %303 : vector<2x128xf32>
    %305 = arith.negf %304 : vector<2x128xf32>
    %306 = math.exp %305 : vector<2x128xf32>
    %cst_61 = arith.constant 1.000000e+00 : f32
    %307 = vector.broadcast %cst_61 : f32 to vector<2x128xf32>
    %308 = arith.addf %307, %306 : vector<2x128xf32>
    %309 = arith.divf %307, %308 : vector<2x128xf32>
    %310 = vector.extract_strided_slice %309 {offsets = [0, 0], sizes = [2, 32], strides = [1, 1]} : vector<2x128xf32> to vector<2x32xf32>
    %311 = vector.extract_strided_slice %309 {offsets = [0, 32], sizes = [2, 32], strides = [1, 1]} : vector<2x128xf32> to vector<2x32xf32>
    %312 = vector.extract_strided_slice %309 {offsets = [0, 64], sizes = [2, 32], strides = [1, 1]} : vector<2x128xf32> to vector<2x32xf32>
    %cst_62 = arith.constant 2.000000e+00 : f32
    %313 = vector.broadcast %cst_62 : f32 to vector<2x32xf32>
    %314 = arith.mulf %313, %312 : vector<2x32xf32>
    %cst_63 = arith.constant 1.000000e+00 : f32
    %315 = vector.broadcast %cst_63 : f32 to vector<2x32xf32>
    %316 = arith.subf %314, %315 : vector<2x32xf32>
    %317 = vector.extract_strided_slice %309 {offsets = [0, 96], sizes = [2, 32], strides = [1, 1]} : vector<2x128xf32> to vector<2x32xf32>
    %318 = arith.mulf %311, %300 : vector<2x32xf32>
    %319 = arith.mulf %310, %316 : vector<2x32xf32>
    %320 = arith.addf %318, %319 : vector<2x32xf32>
    %321 = math.tanh %320 : vector<2x32xf32>
    %322 = arith.mulf %317, %321 : vector<2x32xf32>
    %cst_64 = arith.constant dense<0.000000e+00> : vector<2x128xf32>
    %323 = tpu.matmul %322, %260, %cst_64 {dimension_numbers = #tpu.dot_dimension_numbers<[1], [0], [0], [1], [0, 0, 1, 1], [], []>} : vector<2x32xf32>, vector<32x128xf32>, vector<2x128xf32> -> vector<2x128xf32>
    %324 = arith.addf %251, %323 : vector<2x128xf32>
    %325 = arith.negf %324 : vector<2x128xf32>
    %326 = math.exp %325 : vector<2x128xf32>
    %cst_65 = arith.constant 1.000000e+00 : f32
    %327 = vector.broadcast %cst_65 : f32 to vector<2x128xf32>
    %328 = arith.addf %327, %326 : vector<2x128xf32>
    %329 = arith.divf %327, %328 : vector<2x128xf32>
    %330 = vector.extract_strided_slice %329 {offsets = [0, 0], sizes = [2, 32], strides = [1, 1]} : vector<2x128xf32> to vector<2x32xf32>
    %331 = vector.extract_strided_slice %329 {offsets = [0, 32], sizes = [2, 32], strides = [1, 1]} : vector<2x128xf32> to vector<2x32xf32>
    %332 = vector.extract_strided_slice %329 {offsets = [0, 64], sizes = [2, 32], strides = [1, 1]} : vector<2x128xf32> to vector<2x32xf32>
    %cst_66 = arith.constant 2.000000e+00 : f32
    %333 = vector.broadcast %cst_66 : f32 to vector<2x32xf32>
    %334 = arith.mulf %333, %332 : vector<2x32xf32>
    %cst_67 = arith.constant 1.000000e+00 : f32
    %335 = vector.broadcast %cst_67 : f32 to vector<2x32xf32>
    %336 = arith.subf %334, %335 : vector<2x32xf32>
    %337 = vector.extract_strided_slice %329 {offsets = [0, 96], sizes = [2, 32], strides = [1, 1]} : vector<2x128xf32> to vector<2x32xf32>
    %338 = arith.mulf %331, %320 : vector<2x32xf32>
    %339 = arith.mulf %330, %336 : vector<2x32xf32>
    %340 = arith.addf %338, %339 : vector<2x32xf32>
    %341 = math.tanh %340 : vector<2x32xf32>
    %342 = arith.mulf %337, %341 : vector<2x32xf32>
    %cst_68 = arith.constant dense<0.000000e+00> : vector<2x128xf32>
    %343 = tpu.matmul %342, %260, %cst_68 {dimension_numbers = #tpu.dot_dimension_numbers<[1], [0], [0], [1], [0, 0, 1, 1], [], []>} : vector<2x32xf32>, vector<32x128xf32>, vector<2x128xf32> -> vector<2x128xf32>
    %344 = arith.addf %253, %343 : vector<2x128xf32>
    %345 = arith.negf %344 : vector<2x128xf32>
    %346 = math.exp %345 : vector<2x128xf32>
    %cst_69 = arith.constant 1.000000e+00 : f32
    %347 = vector.broadcast %cst_69 : f32 to vector<2x128xf32>
    %348 = arith.addf %347, %346 : vector<2x128xf32>
    %349 = arith.divf %347, %348 : vector<2x128xf32>
    %350 = vector.extract_strided_slice %349 {offsets = [0, 0], sizes = [2, 32], strides = [1, 1]} : vector<2x128xf32> to vector<2x32xf32>
    %351 = vector.extract_strided_slice %349 {offsets = [0, 32], sizes = [2, 32], strides = [1, 1]} : vector<2x128xf32> to vector<2x32xf32>
    %352 = vector.extract_strided_slice %349 {offsets = [0, 64], sizes = [2, 32], strides = [1, 1]} : vector<2x128xf32> to vector<2x32xf32>
    %cst_70 = arith.constant 2.000000e+00 : f32
    %353 = vector.broadcast %cst_70 : f32 to vector<2x32xf32>
    %354 = arith.mulf %353, %352 : vector<2x32xf32>
    %cst_71 = arith.constant 1.000000e+00 : f32
    %355 = vector.broadcast %cst_71 : f32 to vector<2x32xf32>
    %356 = arith.subf %354, %355 : vector<2x32xf32>
    %357 = vector.extract_strided_slice %349 {offsets = [0, 96], sizes = [2, 32], strides = [1, 1]} : vector<2x128xf32> to vector<2x32xf32>
    %358 = arith.mulf %351, %340 : vector<2x32xf32>
    %359 = arith.mulf %350, %356 : vector<2x32xf32>
    %360 = arith.addf %358, %359 : vector<2x32xf32>
    %361 = math.tanh %360 : vector<2x32xf32>
    %362 = arith.mulf %357, %361 : vector<2x32xf32>
    %cst_72 = arith.constant dense<0.000000e+00> : vector<2x128xf32>
    %363 = tpu.matmul %362, %260, %cst_72 {dimension_numbers = #tpu.dot_dimension_numbers<[1], [0], [0], [1], [0, 0, 1, 1], [], []>} : vector<2x32xf32>, vector<32x128xf32>, vector<2x128xf32> -> vector<2x128xf32>
    %364 = arith.addf %255, %363 : vector<2x128xf32>
    %365 = arith.negf %364 : vector<2x128xf32>
    %366 = math.exp %365 : vector<2x128xf32>
    %cst_73 = arith.constant 1.000000e+00 : f32
    %367 = vector.broadcast %cst_73 : f32 to vector<2x128xf32>
    %368 = arith.addf %367, %366 : vector<2x128xf32>
    %369 = arith.divf %367, %368 : vector<2x128xf32>
    %370 = vector.extract_strided_slice %369 {offsets = [0, 0], sizes = [2, 32], strides = [1, 1]} : vector<2x128xf32> to vector<2x32xf32>
    %371 = vector.extract_strided_slice %369 {offsets = [0, 32], sizes = [2, 32], strides = [1, 1]} : vector<2x128xf32> to vector<2x32xf32>
    %372 = vector.extract_strided_slice %369 {offsets = [0, 64], sizes = [2, 32], strides = [1, 1]} : vector<2x128xf32> to vector<2x32xf32>
    %cst_74 = arith.constant 2.000000e+00 : f32
    %373 = vector.broadcast %cst_74 : f32 to vector<2x32xf32>
    %374 = arith.mulf %373, %372 : vector<2x32xf32>
    %cst_75 = arith.constant 1.000000e+00 : f32
    %375 = vector.broadcast %cst_75 : f32 to vector<2x32xf32>
    %376 = arith.subf %374, %375 : vector<2x32xf32>
    %377 = vector.extract_strided_slice %369 {offsets = [0, 96], sizes = [2, 32], strides = [1, 1]} : vector<2x128xf32> to vector<2x32xf32>
    %378 = arith.mulf %371, %360 : vector<2x32xf32>
    %379 = arith.mulf %370, %376 : vector<2x32xf32>
    %380 = arith.addf %378, %379 : vector<2x32xf32>
    %381 = math.tanh %380 : vector<2x32xf32>
    %382 = arith.mulf %377, %381 : vector<2x32xf32>
    %cst_76 = arith.constant dense<0.000000e+00> : vector<2x128xf32>
    %383 = tpu.matmul %382, %260, %cst_76 {dimension_numbers = #tpu.dot_dimension_numbers<[1], [0], [0], [1], [0, 0, 1, 1], [], []>} : vector<2x32xf32>, vector<32x128xf32>, vector<2x128xf32> -> vector<2x128xf32>
    %384 = arith.addf %257, %383 : vector<2x128xf32>
    %385 = arith.negf %384 : vector<2x128xf32>
    %386 = math.exp %385 : vector<2x128xf32>
    %cst_77 = arith.constant 1.000000e+00 : f32
    %387 = vector.broadcast %cst_77 : f32 to vector<2x128xf32>
    %388 = arith.addf %387, %386 : vector<2x128xf32>
    %389 = arith.divf %387, %388 : vector<2x128xf32>
    %390 = vector.extract_strided_slice %389 {offsets = [0, 0], sizes = [2, 32], strides = [1, 1]} : vector<2x128xf32> to vector<2x32xf32>
    %391 = vector.extract_strided_slice %389 {offsets = [0, 32], sizes = [2, 32], strides = [1, 1]} : vector<2x128xf32> to vector<2x32xf32>
    %392 = vector.extract_strided_slice %389 {offsets = [0, 64], sizes = [2, 32], strides = [1, 1]} : vector<2x128xf32> to vector<2x32xf32>
    %cst_78 = arith.constant 2.000000e+00 : f32
    %393 = vector.broadcast %cst_78 : f32 to vector<2x32xf32>
    %394 = arith.mulf %393, %392 : vector<2x32xf32>
    %cst_79 = arith.constant 1.000000e+00 : f32
    %395 = vector.broadcast %cst_79 : f32 to vector<2x32xf32>
    %396 = arith.subf %394, %395 : vector<2x32xf32>
    %397 = vector.extract_strided_slice %389 {offsets = [0, 96], sizes = [2, 32], strides = [1, 1]} : vector<2x128xf32> to vector<2x32xf32>
    %398 = arith.mulf %391, %380 : vector<2x32xf32>
    %399 = arith.mulf %390, %396 : vector<2x32xf32>
    %400 = arith.addf %398, %399 : vector<2x32xf32>
    %401 = math.tanh %400 : vector<2x32xf32>
    %402 = arith.mulf %397, %401 : vector<2x32xf32>
    %cst_80 = arith.constant dense<0.000000e+00> : vector<2x128xf32>
    %403 = tpu.matmul %402, %260, %cst_80 {dimension_numbers = #tpu.dot_dimension_numbers<[1], [0], [0], [1], [0, 0, 1, 1], [], []>} : vector<2x32xf32>, vector<32x128xf32>, vector<2x128xf32> -> vector<2x128xf32>
    %404 = arith.addf %259, %403 : vector<2x128xf32>
    %405 = arith.negf %404 : vector<2x128xf32>
    %406 = math.exp %405 : vector<2x128xf32>
    %cst_81 = arith.constant 1.000000e+00 : f32
    %407 = vector.broadcast %cst_81 : f32 to vector<2x128xf32>
    %408 = arith.addf %407, %406 : vector<2x128xf32>
    %409 = arith.divf %407, %408 : vector<2x128xf32>
    %410 = vector.extract_strided_slice %409 {offsets = [0, 0], sizes = [2, 32], strides = [1, 1]} : vector<2x128xf32> to vector<2x32xf32>
    %411 = vector.extract_strided_slice %409 {offsets = [0, 32], sizes = [2, 32], strides = [1, 1]} : vector<2x128xf32> to vector<2x32xf32>
    %412 = vector.extract_strided_slice %409 {offsets = [0, 64], sizes = [2, 32], strides = [1, 1]} : vector<2x128xf32> to vector<2x32xf32>
    %cst_82 = arith.constant 2.000000e+00 : f32
    %413 = vector.broadcast %cst_82 : f32 to vector<2x32xf32>
    %414 = arith.mulf %413, %412 : vector<2x32xf32>
    %cst_83 = arith.constant 1.000000e+00 : f32
    %415 = vector.broadcast %cst_83 : f32 to vector<2x32xf32>
    %416 = arith.subf %414, %415 : vector<2x32xf32>
    %417 = vector.extract_strided_slice %409 {offsets = [0, 96], sizes = [2, 32], strides = [1, 1]} : vector<2x128xf32> to vector<2x32xf32>
    %418 = arith.mulf %411, %400 : vector<2x32xf32>
    %419 = arith.mulf %410, %416 : vector<2x32xf32>
    %420 = arith.addf %418, %419 : vector<2x32xf32>
    %421 = math.tanh %420 : vector<2x32xf32>
    %422 = arith.mulf %417, %421 : vector<2x32xf32>
    %cst_84 = arith.constant 0.000000e+00 : f32
    %423 = vector.broadcast %cst_84 : f32 to vector<2x8x32xf32>
    %c0_i32_85 = arith.constant 0 : i32
    %424 = vector.broadcast %c0_i32_85 : i32 to vector<2x8x32xi32>
    %425 = arith.cmpi eq, %2, %424 : vector<2x8x32xi32>
    %426 = vector.shape_cast %282 : vector<2x32xf32> to vector<2x1x32xf32>
    %427 = vector.shape_cast %426 : vector<2x1x32xf32> to vector<2x1x32xf32>
    %428 = vector.broadcast %427 : vector<2x1x32xf32> to vector<2x8x32xf32>
    %429 = arith.select %425, %428, %423 : vector<2x8x32xi1>, vector<2x8x32xf32>
    %c1_i32_86 = arith.constant 1 : i32
    %430 = vector.broadcast %c1_i32_86 : i32 to vector<2x8x32xi32>
    %431 = arith.cmpi eq, %2, %430 : vector<2x8x32xi32>
    %432 = vector.shape_cast %302 : vector<2x32xf32> to vector<2x1x32xf32>
    %433 = vector.shape_cast %432 : vector<2x1x32xf32> to vector<2x1x32xf32>
    %434 = vector.broadcast %433 : vector<2x1x32xf32> to vector<2x8x32xf32>
    %435 = arith.select %431, %434, %429 : vector<2x8x32xi1>, vector<2x8x32xf32>
    %c2_i32_87 = arith.constant 2 : i32
    %436 = vector.broadcast %c2_i32_87 : i32 to vector<2x8x32xi32>
    %437 = arith.cmpi eq, %2, %436 : vector<2x8x32xi32>
    %438 = vector.shape_cast %322 : vector<2x32xf32> to vector<2x1x32xf32>
    %439 = vector.shape_cast %438 : vector<2x1x32xf32> to vector<2x1x32xf32>
    %440 = vector.broadcast %439 : vector<2x1x32xf32> to vector<2x8x32xf32>
    %441 = arith.select %437, %440, %435 : vector<2x8x32xi1>, vector<2x8x32xf32>
    %c3_i32_88 = arith.constant 3 : i32
    %442 = vector.broadcast %c3_i32_88 : i32 to vector<2x8x32xi32>
    %443 = arith.cmpi eq, %2, %442 : vector<2x8x32xi32>
    %444 = vector.shape_cast %342 : vector<2x32xf32> to vector<2x1x32xf32>
    %445 = vector.shape_cast %444 : vector<2x1x32xf32> to vector<2x1x32xf32>
    %446 = vector.broadcast %445 : vector<2x1x32xf32> to vector<2x8x32xf32>
    %447 = arith.select %443, %446, %441 : vector<2x8x32xi1>, vector<2x8x32xf32>
    %c4_i32_89 = arith.constant 4 : i32
    %448 = vector.broadcast %c4_i32_89 : i32 to vector<2x8x32xi32>
    %449 = arith.cmpi eq, %2, %448 : vector<2x8x32xi32>
    %450 = vector.shape_cast %362 : vector<2x32xf32> to vector<2x1x32xf32>
    %451 = vector.shape_cast %450 : vector<2x1x32xf32> to vector<2x1x32xf32>
    %452 = vector.broadcast %451 : vector<2x1x32xf32> to vector<2x8x32xf32>
    %453 = arith.select %449, %452, %447 : vector<2x8x32xi1>, vector<2x8x32xf32>
    %c5_i32_90 = arith.constant 5 : i32
    %454 = vector.broadcast %c5_i32_90 : i32 to vector<2x8x32xi32>
    %455 = arith.cmpi eq, %2, %454 : vector<2x8x32xi32>
    %456 = vector.shape_cast %382 : vector<2x32xf32> to vector<2x1x32xf32>
    %457 = vector.shape_cast %456 : vector<2x1x32xf32> to vector<2x1x32xf32>
    %458 = vector.broadcast %457 : vector<2x1x32xf32> to vector<2x8x32xf32>
    %459 = arith.select %455, %458, %453 : vector<2x8x32xi1>, vector<2x8x32xf32>
    %c6_i32_91 = arith.constant 6 : i32
    %460 = vector.broadcast %c6_i32_91 : i32 to vector<2x8x32xi32>
    %461 = arith.cmpi eq, %2, %460 : vector<2x8x32xi32>
    %462 = vector.shape_cast %402 : vector<2x32xf32> to vector<2x1x32xf32>
    %463 = vector.shape_cast %462 : vector<2x1x32xf32> to vector<2x1x32xf32>
    %464 = vector.broadcast %463 : vector<2x1x32xf32> to vector<2x8x32xf32>
    %465 = arith.select %461, %464, %459 : vector<2x8x32xi1>, vector<2x8x32xf32>
    %c7_i32_92 = arith.constant 7 : i32
    %466 = vector.broadcast %c7_i32_92 : i32 to vector<2x8x32xi32>
    %467 = arith.cmpi eq, %2, %466 : vector<2x8x32xi32>
    %468 = vector.shape_cast %422 : vector<2x32xf32> to vector<2x1x32xf32>
    %469 = vector.shape_cast %468 : vector<2x1x32xf32> to vector<2x1x32xf32>
    %470 = vector.broadcast %469 : vector<2x1x32xf32> to vector<2x8x32xf32>
    %471 = arith.select %467, %470, %465 : vector<2x8x32xi1>, vector<2x8x32xf32>
    %472 = vector.shape_cast %471 : vector<2x8x32xf32> to vector<16x32xf32>
    %c0_93 = arith.constant 0 : index
    %c0_94 = arith.constant 0 : index
    %473 = vector.load %arg8[%c0_93, %c0_94] : memref<32x4xf32, #tpu.memory_space<vmem>>, vector<32x4xf32>
    %cst_95 = arith.constant dense<0.000000e+00> : vector<16x4xf32>
    %474 = tpu.matmul %472, %473, %cst_95 {dimension_numbers = #tpu.dot_dimension_numbers<[1], [0], [0], [1], [0, 0, 1, 1], [], []>} : vector<16x32xf32>, vector<32x4xf32>, vector<16x4xf32> -> vector<16x4xf32>
    %c0_96 = arith.constant 0 : index
    %c0_97 = arith.constant 0 : index
    %475 = vector.load %arg9[%c0_96, %c0_97] : memref<1x4xf32, #tpu.memory_space<vmem>>, vector<1x4xf32>
    %476 = vector.broadcast %475 : vector<1x4xf32> to vector<16x4xf32>
    %477 = arith.addf %474, %476 : vector<16x4xf32>
    %478 = vector.shape_cast %477 : vector<16x4xf32> to vector<2x8x4xf32>
    %c0_98 = arith.constant 0 : index
    %c0_99 = arith.constant 0 : index
    %c0_100 = arith.constant 0 : index
    %479 = vector.load %arg10[%c0_98, %c0_99, %c0_100] : memref<2x8x4xf32, #tpu.memory_space<vmem>>, vector<2x8x4xf32>
    tpu.vector_store %arg10[%c0_98, %c0_99, %c0_100], %478 {strides = array<i32>} : memref<2x8x4xf32, #tpu.memory_space<vmem>>, vector<2x8x4xf32>,
    return
  }
  func.func @transform_0(%arg0: i32) -> (i32, i32, i32) {
    %c0_i32 = arith.constant 0 : i32
    %c0_i32_0 = arith.constant 0 : i32
    %c0_i32_1 = arith.constant 0 : i32
    return %arg0, %c0_i32, %c0_i32_0 : i32, i32, i32
  }
  func.func @transform_1(%arg0: i32) -> (i32, i32) {
    %c0_i32 = arith.constant 0 : i32
    %c0_i32_0 = arith.constant 0 : i32
    %c0_i32_1 = arith.constant 0 : i32
    return %c0_i32, %c0_i32_0 : i32, i32
  }
  func.func @transform_2(%arg0: i32) -> (i32, i32) {
    %c0_i32 = arith.constant 0 : i32
    %c0_i32_0 = arith.constant 0 : i32
    %c0_i32_1 = arith.constant 0 : i32
    return %c0_i32, %c0_i32_0 : i32, i32
  }
  func.func @transform_3(%arg0: i32) -> (i32, i32) {
    %c0_i32 = arith.constant 0 : i32
    %c0_i32_0 = arith.constant 0 : i32
    %c0_i32_1 = arith.constant 0 : i32
    return %c0_i32, %c0_i32_0 : i32, i32
  }
  func.func @transform_4(%arg0: i32) -> (i32, i32) {
    %c0_i32 = arith.constant 0 : i32
    %c0_i32_0 = arith.constant 0 : i32
    %c0_i32_1 = arith.constant 0 : i32
    return %c0_i32, %c0_i32_0 : i32, i32
  }
  func.func @transform_5(%arg0: i32) -> (i32, i32) {
    %c0_i32 = arith.constant 0 : i32
    %c0_i32_0 = arith.constant 0 : i32
    %c0_i32_1 = arith.constant 0 : i32
    return %c0_i32, %c0_i32_0 : i32, i32
  }
  func.func @transform_6(%arg0: i32) -> (i32, i32) {
    %c0_i32 = arith.constant 0 : i32
    %c0_i32_0 = arith.constant 0 : i32
    %c0_i32_1 = arith.constant 0 : i32
    return %c0_i32, %c0_i32_0 : i32, i32
  }
  func.func @transform_7(%arg0: i32) -> (i32, i32) {
    %c0_i32 = arith.constant 0 : i32
    %c0_i32_0 = arith.constant 0 : i32
    %c0_i32_1 = arith.constant 0 : i32
    return %c0_i32, %c0_i32_0 : i32, i32
  }
  func.func @transform_8(%arg0: i32) -> (i32, i32) {
    %c0_i32 = arith.constant 0 : i32
    %c0_i32_0 = arith.constant 0 : i32
    %c0_i32_1 = arith.constant 0 : i32
    return %c0_i32, %c0_i32_0 : i32, i32
  }
  func.func @transform_9(%arg0: i32) -> (i32, i32, i32) {
    %c0_i32 = arith.constant 0 : i32
    %c0_i32_0 = arith.constant 0 : i32
    %c0_i32_1 = arith.constant 0 : i32
    return %arg0, %c0_i32, %c0_i32_0 : i32, i32, i32
  }
}

</mosaic_0001>

<bundles_post_ra>
// kernel: lstm_model_forward.1
= control target key start
LH: loop header
LB: loop body
LE: loop exit
PB: predicated region body
PF: predicated region fallthrough
CT: control target
= control target key end

     0   :  { %14 = vsyncpa [#allocation3], 0  ;;  %s4244_s0 = inlined_call_operand.hbm [shape: f32[2,8,16], index: 0, kind: input, shape index: {}]   ;;  %s4245_s1 = inlined_call_operand.hbm [shape: f32[16,128], index: 1, kind: input, shape index: {}]   ;;  %s4246_s2 = inlined_call_operand.vmem [shape: f32[32,128], index: 2, kind: input, shape index: {}]   ;;  %s4247_s3 = inlined_call_operand.vmem [shape: f32[1,128], index: 3, kind: input, shape index: {}]   ;;  %s4248_s4 = inlined_call_operand.hbm [shape: f32[32,128], index: 4, kind: input, shape index: {}]   ;;  %s4249_s5 = inlined_call_operand.hbm [shape: f32[32,128], index: 5, kind: input, shape index: {}]   ;;  %s4250_s6 = inlined_call_operand.vmem [shape: f32[1,128], index: 6, kind: input, shape index: {}]   ;;  %s4251_s7 = inlined_call_operand.vmem [shape: f32[32,4], index: 7, kind: input, shape index: {}]   ;;  %s4252_s8 = inlined_call_operand.vmem [shape: f32[1,4], index: 8, kind: input, shape index: {}]   ;;  %s4253_s9 = inlined_call_operand.vmem [shape: f32[2,8,4], index: 9, kind: output, shape index: {}]  }
   0x1   :  { %15 = vsyncpa [#allocation5], 0 }
   0x2   :  { %16 = vsyncpa [#allocation8], 0  ;;  %s3475_s30 = smov [#allocation4]   ;;  %s3476_s11 = smov [#allocation2]  }
   0x3   :  { %s34_s10 = sshll.u32 %s3475_s30, 4  ;;  %s22_s12 = sshll.u32 %s3476_s11, 4  ;;  %s35_s10 = int_to_ptr.vmem [resolvable:$true] %s34_s10  ;;  %s23_s12 = int_to_ptr.vmem [resolvable:$true] %s22_s12 }
   0x4   :  { %s3397_s13 = scalar_lea.vmem %s35_s10, 256  ;;  %p3402_p1 = scmp.lt.s32.totalorder %s35_s10, %s35_s10 }
   0x5   :  { %p3398_p0 = scmp.ne.s32.totalorder %s35_s10, %s3397_s13  ;;  %p3403_p2 = scmp.lt.s32.totalorder %s3397_s13, %s3397_s13 }
   0x7   :  { %p3404_p3 = por %p3403_p2, %p3402_p1 }
   0x9   :  { %p3405_p4 = pnand %p3404_p3, %p3398_p0 }
   0xb   :  { %3408 = shalt.err (!%p3405_p4)
}
   0xc   :  { %s3477_s14 = smov 128   ;;  %s3478_s15 = smov 8  }
   0xd   :  { %40 = dma.hbm_to_vmem [thread:$0]  %s4245_s1, 256, %s35_s10, [#allocation5], %s3477_s14, %s3477_s14, %s3478_s15  }
   0xe   :  { %s3417_s18 = scalar_lea.vmem %s23_s12, 256  ;;  %p3422_p6 = scmp.lt.s32.totalorder %s23_s12, %s23_s12 }
   0xf   :  { %p3418_p5 = scmp.ne.s32.totalorder %s23_s12, %s3417_s18  ;;  %p3423_p7 = scmp.lt.s32.totalorder %s3417_s18, %s3417_s18 }
  0x11   :  { %p3424_p8 = por %p3423_p7, %p3422_p6 }
  0x13   :  { %p3425_p9 = pnand %p3424_p8, %p3418_p5 }
  0x15   :  { %3428 = shalt.err (!%p3425_p9)
}
  0x16   :  { %28 = dma.hbm_to_vmem [thread:$0]  %s4244_s0, 256, %s23_s12, [#allocation3], %s3477_s14, %s3477_s14, %s3478_s15  }
  0x17   :  { %s3479_s21 = smov [#allocation6]   ;;  %s3480_s23 = smov [#allocation7]  }
  0x18   :  { %s50_s22 = sshll.u32 %s3479_s21, 4  ;;  %s62_s24 = sshll.u32 %s3480_s23, 4  ;;  %s51_s22 = int_to_ptr.vmem [resolvable:$true] %s50_s22  ;;  %s63_s24 = int_to_ptr.vmem [resolvable:$true] %s62_s24 }
  0x19   :  { %s3437_s1 = scalar_lea.vmem %s51_s22, 512  ;;  %p3442_p11 = scmp.lt.s32.totalorder %s51_s22, %s51_s22 }
  0x1a   :  { %p3438_p10 = scmp.ne.s32.totalorder %s51_s22, %s3437_s1  ;;  %p3443_p12 = scmp.lt.s32.totalorder %s3437_s1, %s3437_s1 }
  0x1c   :  { %p3444_p13 = por %p3443_p12, %p3442_p11 }
  0x1e   :  { %p3445_p0 = pnand %p3444_p13, %p3438_p10 }
  0x20   :  { %3448 = shalt.err (!%p3445_p0)
}
  0x21   :  { %56 = dma.hbm_to_vmem [thread:$0]  %s4248_s4, 512, %s51_s22, [#allocation5], %s3477_s14, %s3477_s14, %s3478_s15  }
  0x22   :  { %s3457_s0 = scalar_lea.vmem %s63_s24, 512  ;;  %p3462_p2 = scmp.lt.s32.totalorder %s63_s24, %s63_s24 }
  0x23   :  { %p3458_p1 = scmp.ne.s32.totalorder %s63_s24, %s3457_s0  ;;  %p3463_p3 = scmp.lt.s32.totalorder %s3457_s0, %s3457_s0 }
  0x25   :  { %p3464_p4 = por %p3463_p3, %p3462_p2 }
  0x27   :  { %p3465_p5 = pnand %p3464_p4, %p3458_p1 }
  0x29   :  { %3468 = shalt.err (!%p3465_p5)
}
  0x2a   :  { %68 = dma.hbm_to_vmem [thread:$0]  %s4249_s5, 512, %s63_s24, [#allocation8], %s3477_s14, %s3477_s14, %s3478_s15  }
  0x2b   :  { %3469 = dma.done.wait [#allocation3], 256  }
  0x2c   :  { %3470 = vsyncadd [#allocation3], 4294967040 }
  0x2d   :  { %3471 = dma.done.wait [#allocation5], 768  }
  0x2e   :  { %3472 = vsyncadd [#allocation5], 4294966528 }
  0x2f   :  { %3473 = dma.done.wait [#allocation8], 512  }
  0x30   :  { %3474 = vsyncadd [#allocation8], 4294966784  ;;  %v3481_v0 = vmov 0.0   ;;  %vm3482_vm0 = vmmov 0   ;;  %v92_v1 = vld [vmem:[#allocation4 + $0x8] sm:$0xff]  ;;  %v91_v3 = vld [vmem:[#allocation4] sm:$0xff] }
  0x31   :  { %2989 = vmatprep.subr.mxu1 %v3481_v0  ;;  %2997 = vmatprep.mubr.msk.f32.mxu1 %vm3482_vm0, %v3481_v0  ;;  %v3565_v2 = vld [vmem:[%s4246_s2 + $0x18] sm:$0xff]  ;;  %v3571_v4 = vld [vmem:[%s4246_s2 + $0x10] sm:$0xff]  ;;  %v87_v5 = vld [vmem:[#allocation2] sm:$0xff]  ;;  %vm100_vm1 = vcmask 130048   ;;  %s3484_s15 = smov 32   ;;  %vm319_vm2 = vcmask 1041409  }
  0x32   :  { %2982 = vmatprep.subr.mxu0 %v92_v1  ;;  %2990 = vmatpush3.msra.mxu1 %v3565_v2  ;;  %v88_v6 = vld [vmem:[#allocation2 + $0x8] sm:$0xff]  ;;  %v3584_v8 = vld [vmem:[%s4246_s2] sm:$0xff]  ;;  %vm186_vm3 = vcmask 261120   ;;  %vm2789_vm12 = vcmask 31744  }
  0x33   :  { %2983 = vmatpush3.msra.mxu0 %v92_v1  ;;  %2991 = vmatprep.subr.mxu1 %v3481_v0  ;;  %v3578_v7 = vld [vmem:[%s4246_s2 + $0x8] sm:$0xff]  ;;  %v2799_v10 = vld [vmem:[%s4247_s3] ss:$0 sm:$0xff]  ;;  %s3483_s3 = smov 64  }
  0x34   :  { %2984 = vmatprep.subr.mxu0 %v91_v3  ;;  %2992 = vmatpush3.msra.mxu1 %v3571_v4 }
  0x35   :  { %2985 = vmatpush3.msra.mxu0 %v91_v3  ;;  %2986 = vmatprep.mubr.msk.f32.mxu0 %vm100_vm1, %v87_v5 }
  0x36   :  { %2993 = vmatprep.subr.mxu1 %v3481_v0  ;;  %2987 = vmatmul.mubr.msk.f32.vlgmr.msra.gmra.mxu0 %vm100_vm1, %v88_v6 }
  0x37   :  { %2994 = vmatpush3.msra.mxu1 %v3578_v7  ;;  %3000 = vmatprep.subr.mxu0 %v3481_v0 }
  0x38   :  { %2995 = vmatprep.subr.mxu1 %v3481_v0  ;;  %3001 = vmatpush3.msra.mxu0 %v3565_v2 }
  0x39   :  { %2996 = vmatpush3.msra.mxu1 %v3584_v8  ;;  %3002 = vmatprep.subr.mxu0 %v3481_v0 }
  0x3a   :  { %2998 = vmatmul.mubr.f32.vlgmr.msra.gmra.mxu1 %v3481_v0  ;;  %3003 = vmatpush3.msra.mxu0 %v3571_v4 }
  0x3b   :  { %3004 = vmatprep.subr.mxu0 %v3481_v0  ;;  %3008 = vmatprep.mubr.msk.f32.mxu0 %vm3482_vm0, %v3481_v0 }
  0x3c   :  { %3005 = vmatpush3.msra.mxu0 %v3578_v7  ;;  %3011 = vmatprep.subr.mxu1 %v3481_v0 }
  0x3d   :  { %3006 = vmatprep.subr.mxu0 %v3481_v0  ;;  %3012 = vmatpush3.msra.mxu1 %v3565_v2 }
  0x3e   :  { %3007 = vmatpush3.msra.mxu0 %v3584_v8  ;;  %3013 = vmatprep.subr.mxu1 %v3481_v0 }
  0x3f   :  { %3014 = vmatpush3.msra.mxu1 %v3571_v4  ;;  %3019 = vmatprep.mubr.msk.f32.mxu1 %vm3482_vm0, %v3481_v0 }
  0x40   :  { %3015 = vmatprep.subr.mxu1 %v3481_v0  ;;  %3022 = vmatprep.subr.mxu0 %v3481_v0 }
  0x41   :  { %3016 = vmatpush3.msra.mxu1 %v3578_v7 }
  0x42   :  { %3017 = vmatprep.subr.mxu1 %v3481_v0 }
  0x43   :  { %3018 = vmatpush3.msra.mxu1 %v3584_v8 }
  0x44   :  { %3033 = vmatprep.subr.mxu1 %v3481_v0 }
  0xf6   :  { %v2988_v9 = vpop.f32.mrf.mxu0 }
  0xf7   :  { %v3615_v12 = vadd.f32 %v2988_v9, %v2799_v10 }
  0xf8   :  { %v173_v11 = vpop.f32.mrf.mxu0 }
  0xf9   :  { %v3617_v13 = vadd.f32 %v2799_v10, %v173_v11 }
  0xfa   :  { %v256_v14 = vpop.f32.mrf.mxu1 }
  0xfb   :  { %v261_v15 = vrot.slane %v256_v14, 1  ;;  %v264_v16 = vadd.f32 %v256_v14, %v3617_v13 }
  0xfc   :  { %v2999_v17 = vpop.f32.mrf.mxu1 }
  0xfd   :  { %v265_v18 = vadd.f32 %v261_v15, %v3615_v12  ;;  %v2802_v19 = vmul.f32 -1.442695, %v264_v16 }
  0xff   :  { %3197 = vpow2.f32 %v2802_v19  ;;  %v2803_v20 = vmul.f32 -1.442695, %v265_v18 }
 0x101   :  { %3199 = vpow2.f32 %v2803_v20 }
 0x10c   :  { %v3198_v21 = vpop.eup %3197 }
 0x10d   :  { %v272_v22 = vadd.f32 1.0, %v3198_v21 }
 0x10e   :  { %v3200_v23 = vpop.eup %3199 }
 0x10f   :  { %v273_v24 = vadd.f32 1.0, %v3200_v23  ;;  %3201 = vrcp.f32 %v272_v22 }
 0x111   :  { %3203 = vrcp.f32 %v273_v24  ;;  %v89_v24 = vlaneseq }
 0x11c   :  { %v3202_v25 = vpop.eup %3201 }
 0x11d   :  { %v278_v29 = vmul.f32 2.0, %v3202_v25  ;;  %v282_v38 = vmul.f32 0.0, %v3202_v25 }
 0x11e   :  { %v3204_v26 = vpop.eup %3203 }
 0x11f   :  { %v279_v27 = vmul.f32 2.0, %v3204_v26  ;;  %v2804_v30 = vadd.f32 -1.0, %v278_v29  ;;  %v283_v35 = vmul.f32 0.0, %v3204_v26 }
 0x121   :  { %v2805_v28 = vadd.f32 -1.0, %v279_v27 }
 0x123   :  { %288 = vrot.lane.b32.xlu0 %v2805_v28, %s3483_s3 }
 0x127   :  { %286 = vrot.lane.b32.xlu0 %v2804_v30, %s3483_s3 }
 0x195   :  { %v289_v31 = vpop.permute.xlu0 %288 }
 0x196   :  { %v293_v32 = vmul.f32 %v3204_v26, %v289_v31 }
 0x198   :  { %298 = vrot.lane.b32.xlu1 %v293_v32, %s3484_s15 }
 0x199   :  { %v287_v33 = vpop.permute.xlu0 %286 }
 0x19a   :  { %v292_v34 = vmul.f32 %v3202_v25, %v287_v33 }
 0x19c   :  { %296 = vrot.lane.b32.xlu1 %v292_v34, %s3484_s15 }
 0x20a   :  { %v299_v36 = vpop.permute.xlu1 %298 }
 0x20b   :  { %v303_v37 = vadd.f32 %v299_v36, %v283_v35 }
 0x20d   :  { %3205 = vtanh.f32 %v303_v37  ;;  %v420_v14 = vrot.slane %v303_v37, 7 }
 0x20e   :  { %v297_v39 = vpop.permute.xlu1 %296 }
 0x20f   :  { %v302_v40 = vadd.f32 %v297_v39, %v282_v38 }
 0x211   :  { %3207 = vtanh.f32 %v302_v40  ;;  %v419_v15 = vrot.slane %v302_v40, 7 }
 0x21a   :  { %v3206_v41 = vpop.eup %3205 }
 0x21b   :  { %310 = vrot.lane.b32.xlu0 %v3206_v41, %s3483_s3 }
 0x21e   :  { %v3208_v42 = vpop.eup %3207 }
 0x21f   :  { %308 = vrot.lane.b32.xlu1 %v3208_v42, %s3483_s3 }
 0x28d   :  { %v311_v43 = vpop.permute.xlu0 %310 }
 0x28e   :  { %v3627_v44 = vmul.f32 %v3204_v26, %v311_v43 }
 0x290   :  { %v318_v46 = vrot.slane %v3627_v44, 7 }
 0x291   :  { %v309_v45 = vpop.permute.xlu1 %308 }
 0x292   :  { %v3630_v47 = vmul.f32 %v3202_v25, %v309_v45  ;;  %v3660_v25 = vshrl.u32 %v89_v24, 7 }
 0x294   :  { %v320_v48 = vsel %vm319_vm2, %v318_v46, %v3630_v47  ;;  %v3663_v26 = vsub.s32 0, %v3660_v25  ;;  %v3666_v27 = vsub.s32 1, %v3660_v25  ;;  %vm1308_vm4 = vcmp.eq.s32.totalorder %v3660_v25, 0 }
 0x295   :  { %321 = vrot.lane.b32.xlu0 %v320_v48, %s3484_s15  ;;  %vm1319_vm5 = vcmp.eq.s32.totalorder %v3660_v25, 1  ;;  %vm1330_vm6 = vcmp.eq.s32.totalorder %v3660_v25, 2  ;;  %vm1341_vm7 = vcmp.eq.s32.totalorder %v3660_v25, 3  ;;  %vm1352_vm8 = vcmp.eq.s32.totalorder %v3660_v25, 4 }
 0x296   :  { %v1316_v28 = vrot.slane %v3627_v44, %v3663_v26  ;;  %v1312_v31 = vrot.slane %v3630_v47, %v3663_v26  ;;  %vm1363_vm9 = vcmp.eq.s32.totalorder %v3660_v25, 5  ;;  %vm1374_vm10 = vcmp.eq.s32.totalorder %v3660_v25, 6 }
 0x297   :  { %vm1385_vm11 = vcmp.eq.s32.totalorder %v3660_v25, 7 }
 0x298   :  { %v1318_v35 = vsel %vm1308_vm4, %v1316_v28, 0.0  ;;  %v1317_v39 = vsel %vm1308_vm4, %v1312_v31, 0.0 }
 0x307   :  { %v322_v49 = vpop.permute.xlu0 %321 }
 0x308   :  { %3009 = vmatmul.mubr.msk.f32.vlgmr.msra.gmra.mxu0 %vm186_vm3, %v322_v49 }
 0x309   :  { %3023 = vmatpush3.msra.mxu0 %v3565_v2  ;;  %3030 = vmatprep.mubr.msk.f32.mxu0 %vm3482_vm0, %v3481_v0 }
 0x30a   :  { %3024 = vmatprep.subr.mxu0 %v3481_v0 }
 0x30b   :  { %3025 = vmatpush3.msra.mxu0 %v3571_v4 }
 0x30c   :  { %3026 = vmatprep.subr.mxu0 %v3481_v0 }
 0x30d   :  { %3027 = vmatpush3.msra.mxu0 %v3578_v7 }
 0x30e   :  { %3028 = vmatprep.subr.mxu0 %v3481_v0 }
 0x30f   :  { %3029 = vmatpush3.msra.mxu0 %v3584_v8 }
 0x310   :  { %3044 = vmatprep.subr.mxu0 %v3481_v0 }
 0x3c8   :  { %v391_v50 = vpop.f32.mrf.mxu0 }
 0x3c9   :  { %v396_v51 = vrot.slane %v391_v50, 7  ;;  %v400_v52 = vadd.f32 %v391_v50, %v3615_v12 }
 0x3ca   :  { %v3010_v53 = vpop.f32.mrf.mxu0 }
 0x3cb   :  { %v399_v54 = vadd.f32 %v396_v51, %v3617_v13  ;;  %v2808_v55 = vmul.f32 -1.442695, %v400_v52 }
 0x3cd   :  { %v2807_v56 = vmul.f32 -1.442695, %v399_v54  ;;  %3209 = vpow2.f32 %v2808_v55 }
 0x3cf   :  { %3211 = vpow2.f32 %v2807_v56 }
 0x3da   :  { %v3210_v57 = vpop.eup %3209 }
 0x3db   :  { %v408_v58 = vadd.f32 1.0, %v3210_v57 }
 0x3dc   :  { %v3212_v59 = vpop.eup %3211 }
 0x3dd   :  { %v407_v60 = vadd.f32 1.0, %v3212_v59  ;;  %3213 = vrcp.f32 %v408_v58 }
 0x3df   :  { %3215 = vrcp.f32 %v407_v60 }
 0x3ea   :  { %v3214_v61 = vpop.eup %3213 }
 0x3eb   :  { %v414_v62 = vmul.f32 2.0, %v3214_v61  ;;  %v424_v16 = vmul.f32 %v3214_v61, %v420_v14 }
 0x3ec   :  { %v3216_v63 = vpop.eup %3215 }
 0x3ed   :  { %v2810_v1 = vadd.f32 -1.0, %v414_v62  ;;  %v413_v3 = vmul.f32 2.0, %v3216_v63  ;;  %v423_v19 = vmul.f32 %v3216_v63, %v419_v15 }
 0x3ef   :  { %429 = vrot.lane.b32.xlu0 %v2810_v1, %s3483_s3  ;;  %v2809_v5 = vadd.f32 -1.0, %v413_v3 }
 0x3f1   :  { %427 = vrot.lane.b32.xlu1 %v2809_v5, %s3483_s3 }
 0x461   :  { %v430_v6 = vpop.permute.xlu0 %429 }
 0x462   :  { %v434_v9 = vmul.f32 %v3214_v61, %v430_v6 }
 0x463   :  { %v428_v10 = vpop.permute.xlu1 %427 }
 0x464   :  { %v433_v11 = vmul.f32 %v3216_v63, %v428_v10  ;;  %439 = vrot.lane.b32.xlu0 %v434_v9, %s3484_s15 }
 0x466   :  { %437 = vrot.lane.b32.xlu1 %v433_v11, %s3484_s15 }
 0x4d6   :  { %v440_v17 = vpop.permute.xlu0 %439 }
 0x4d7   :  { %v3652_v18 = vadd.f32 %v440_v17, %v424_v16 }
 0x4d8   :  { %v438_v20 = vpop.permute.xlu1 %437 }
 0x4d9   :  { %3217 = vtanh.f32 %v3652_v18  ;;  %v3655_v21 = vadd.f32 %v438_v20, %v423_v19  ;;  %v561_v5 = vrot.slane %v3652_v18, 7  ;;  %v3718_v18 = vsub.s32 2, %v3660_v25 }
 0x4db   :  { %3219 = vtanh.f32 %v3655_v21  ;;  %v560_v3 = vrot.slane %v3655_v21, 7 }
 0x4e6   :  { %v3218_v22 = vpop.eup %3217 }
 0x4e7   :  { %451 = vrot.lane.b32.xlu0 %v3218_v22, %s3483_s3 }
 0x4e8   :  { %v3220_v23 = vpop.eup %3219 }
 0x4e9   :  { %449 = vrot.lane.b32.xlu1 %v3220_v23, %s3483_s3 }
 0x559   :  { %v452_v29 = vpop.permute.xlu0 %451 }
 0x55a   :  { %v456_v30 = vmul.f32 %v3214_v61, %v452_v29 }
 0x55b   :  { %v450_v32 = vpop.permute.xlu1 %449 }
 0x55c   :  { %v1327_v33 = vrot.slane %v456_v30, %v3666_v27  ;;  %v455_v34 = vmul.f32 %v3216_v63, %v450_v32 }
 0x55e   :  { %v3679_v36 = vsel %vm1319_vm5, %v1327_v33, %v1318_v35  ;;  %v459_v37 = vrot.slane %v455_v34, 1  ;;  %v1323_v38 = vrot.slane %v455_v34, %v3666_v27 }
 0x560   :  { %v3686_v40 = vsel %vm1319_vm5, %v1323_v38, %v1317_v39  ;;  %v460_v41 = vsel %vm319_vm2, %v456_v30, %v459_v37 }
 0x561   :  { %461 = vrot.lane.b32.xlu1 %v460_v41, %s3484_s15 }
 0x5d3   :  { %v462_v42 = vpop.permute.xlu1 %461 }
 0x5d4   :  { %3020 = vmatmul.mubr.msk.f32.vlgmr.msra.gmra.mxu1 %vm186_vm3, %v462_v42 }
 0x5d5   :  { %3034 = vmatpush3.msra.mxu1 %v3565_v2  ;;  %3041 = vmatprep.mubr.msk.f32.mxu1 %vm3482_vm0, %v3481_v0 }
 0x5d6   :  { %3035 = vmatprep.subr.mxu1 %v3481_v0 }
 0x5d7   :  { %3036 = vmatpush3.msra.mxu1 %v3571_v4 }
 0x5d8   :  { %3037 = vmatprep.subr.mxu1 %v3481_v0 }
 0x5d9   :  { %3038 = vmatpush3.msra.mxu1 %v3578_v7 }
 0x5da   :  { %3039 = vmatprep.subr.mxu1 %v3481_v0 }
 0x5db   :  { %3040 = vmatpush3.msra.mxu1 %v3584_v8 }
 0x5dc   :  { %3055 = vmatprep.subr.mxu1 %v3481_v0 }
 0x694   :  { %v531_v43 = vpop.f32.mrf.mxu1 }
 0x695   :  { %v536_v44 = vrot.slane %v531_v43, 6  ;;  %v537_v45 = vrot.slane %v531_v43, 7 }
 0x696   :  { %v3021_v46 = vpop.f32.mrf.mxu1 }
 0x697   :  { %v540_v47 = vadd.f32 %v536_v44, %v3617_v13  ;;  %v541_v48 = vadd.f32 %v537_v45, %v3615_v12 }
 0x699   :  { %v2812_v49 = vmul.f32 -1.442695, %v540_v47  ;;  %v2813_v50 = vmul.f32 -1.442695, %v541_v48 }
 0x69b   :  { %3221 = vpow2.f32 %v2812_v49 }
 0x69c   :  { %3223 = vpow2.f32 %v2813_v50 }
 0x6a8   :  { %v3222_v51 = vpop.eup %3221 }
 0x6a9   :  { %v3224_v52 = vpop.eup %3223  ;;  %v548_v53 = vadd.f32 1.0, %v3222_v51 }
 0x6aa   :  { %v549_v54 = vadd.f32 1.0, %v3224_v52 }
 0x6ab   :  { %3225 = vrcp.f32 %v548_v53 }
 0x6ac   :  { %3227 = vrcp.f32 %v549_v54 }
 0x6b8   :  { %v3226_v55 = vpop.eup %3225 }
 0x6b9   :  { %v3228_v56 = vpop.eup %3227  ;;  %v554_v57 = vmul.f32 2.0, %v3226_v55  ;;  %v564_v6 = vmul.f32 %v3226_v55, %v560_v3 }
 0x6ba   :  { %v555_v58 = vmul.f32 2.0, %v3228_v56  ;;  %v565_v9 = vmul.f32 %v3228_v56, %v561_v5  ;;  %v3763_v5 = vsub.s32 3, %v3660_v25 }
 0x6bb   :  { %v2814_v59 = vadd.f32 -1.0, %v554_v57 }
 0x6bc   :  { %v2815_v60 = vadd.f32 -1.0, %v555_v58 }
 0x6bd   :  { %568 = vrot.lane.b32.xlu0 %v2814_v59, %s3483_s3 }
 0x6be   :  { %570 = vrot.lane.b32.xlu1 %v2815_v60, %s3483_s3 }
 0x72f   :  { %v569_v61 = vpop.permute.xlu0 %568 }
 0x730   :  { %v571_v62 = vpop.permute.xlu1 %570  ;;  %v574_v63 = vmul.f32 %v3226_v55, %v569_v61 }
 0x731   :  { %v575_v1 = vmul.f32 %v3228_v56, %v571_v62 }
 0x732   :  { %578 = vrot.lane.b32.xlu0 %v574_v63, %s3484_s15 }
 0x733   :  { %580 = vrot.lane.b32.xlu1 %v575_v1, %s3484_s15 }
 0x7a4   :  { %v579_v10 = vpop.permute.xlu0 %578 }
 0x7a5   :  { %v581_v11 = vpop.permute.xlu1 %580  ;;  %v3709_v14 = vadd.f32 %v579_v10, %v564_v6 }
 0x7a6   :  { %v3711_v15 = vadd.f32 %v581_v11, %v565_v9 }
 0x7a7   :  { %3229 = vtanh.f32 %v3709_v14 }
 0x7a8   :  { %3231 = vtanh.f32 %v3711_v15  ;;  %v703_v57 = vrot.slane %v3711_v15, 7 }
 0x7b4   :  { %v3230_v16 = vpop.eup %3229 }
 0x7b5   :  { %v3232_v17 = vpop.eup %3231  ;;  %590 = vrot.lane.b32.xlu0 %v3230_v16, %s3483_s3 }
 0x7b6   :  { %592 = vrot.lane.b32.xlu1 %v3232_v17, %s3483_s3 }
 0x827   :  { %v591_v19 = vpop.permute.xlu0 %590 }
 0x828   :  { %v593_v20 = vpop.permute.xlu1 %592  ;;  %v596_v21 = vmul.f32 %v3226_v55, %v591_v19 }
 0x829   :  { %v597_v22 = vmul.f32 %v3228_v56, %v593_v20  ;;  %v702_v56 = vrot.slane %v3709_v14, 7 }
 0x82a   :  { %v600_v23 = vrot.slane %v596_v21, 2  ;;  %v1334_v24 = vrot.slane %v596_v21, %v3718_v18 }
 0x82b   :  { %v601_v28 = vrot.slane %v597_v22, 1  ;;  %v1338_v29 = vrot.slane %v597_v22, %v3718_v18 }
 0x82c   :  { %v3726_v30 = vsel %vm1330_vm6, %v1334_v24, %v3686_v40 }
 0x82d   :  { %v3731_v31 = vsel %vm1330_vm6, %v1338_v29, %v3679_v36  ;;  %v602_v32 = vsel %vm319_vm2, %v601_v28, %v600_v23 }
 0x82e   :  { %603 = vrot.lane.b32.xlu0 %v602_v32, %s3484_s15 }
 0x8a0   :  { %v604_v33 = vpop.permute.xlu0 %603 }
 0x8a1   :  { %3031 = vmatmul.mubr.msk.f32.vlgmr.msra.gmra.mxu0 %vm186_vm3, %v604_v33 }
 0x8a2   :  { %3045 = vmatpush3.msra.mxu0 %v3565_v2  ;;  %3052 = vmatprep.mubr.msk.f32.mxu0 %vm3482_vm0, %v3481_v0 }
 0x8a3   :  { %3046 = vmatprep.subr.mxu0 %v3481_v0 }
 0x8a4   :  { %3047 = vmatpush3.msra.mxu0 %v3571_v4 }
 0x8a5   :  { %3048 = vmatprep.subr.mxu0 %v3481_v0 }
 0x8a6   :  { %3049 = vmatpush3.msra.mxu0 %v3578_v7 }
 0x8a7   :  { %3050 = vmatprep.subr.mxu0 %v3481_v0 }
 0x8a8   :  { %3051 = vmatpush3.msra.mxu0 %v3584_v8 }
 0x8a9   :  { %3066 = vmatprep.subr.mxu0 %v3481_v0 }
 0x961   :  { %v673_v34 = vpop.f32.mrf.mxu0 }
 0x962   :  { %v678_v35 = vrot.slane %v673_v34, 5  ;;  %v679_v36 = vrot.slane %v673_v34, 6 }
 0x963   :  { %v3032_v37 = vpop.f32.mrf.mxu0 }
 0x964   :  { %v682_v38 = vadd.f32 %v678_v35, %v3617_v13  ;;  %v683_v39 = vadd.f32 %v679_v36, %v3615_v12 }
 0x966   :  { %v2817_v40 = vmul.f32 -1.442695, %v682_v38  ;;  %v2818_v41 = vmul.f32 -1.442695, %v683_v39 }
 0x968   :  { %3233 = vpow2.f32 %v2817_v40 }
 0x969   :  { %3235 = vpow2.f32 %v2818_v41 }
 0x975   :  { %v3234_v42 = vpop.eup %3233 }
 0x976   :  { %v3236_v43 = vpop.eup %3235  ;;  %v690_v44 = vadd.f32 1.0, %v3234_v42 }
 0x977   :  { %v691_v45 = vadd.f32 1.0, %v3236_v43 }
 0x978   :  { %3237 = vrcp.f32 %v690_v44 }
 0x979   :  { %3239 = vrcp.f32 %v691_v45 }
 0x985   :  { %v3238_v46 = vpop.eup %3237 }
 0x986   :  { %v3240_v47 = vpop.eup %3239  ;;  %v696_v48 = vmul.f32 2.0, %v3238_v46  ;;  %v706_v58 = vmul.f32 %v3238_v46, %v702_v56 }
 0x987   :  { %v697_v49 = vmul.f32 2.0, %v3240_v47  ;;  %v707_v59 = vmul.f32 %v3240_v47, %v703_v57 }
 0x988   :  { %v2819_v50 = vadd.f32 -1.0, %v696_v48 }
 0x989   :  { %v2820_v51 = vadd.f32 -1.0, %v697_v49 }
 0x98a   :  { %710 = vrot.lane.b32.xlu1 %v2819_v50, %s3483_s3 }
 0x98b   :  { %712 = vrot.lane.b32.xlu0 %v2820_v51, %s3483_s3 }
 0x9fc   :  { %v711_v52 = vpop.permute.xlu1 %710 }
 0x9fd   :  { %v713_v53 = vpop.permute.xlu0 %712  ;;  %v716_v54 = vmul.f32 %v3238_v46, %v711_v52 }
 0x9fe   :  { %v717_v55 = vmul.f32 %v3240_v47, %v713_v53 }
 0x9ff   :  { %720 = vrot.lane.b32.xlu1 %v716_v54, %s3484_s15 }
 0xa00   :  { %722 = vrot.lane.b32.xlu0 %v717_v55, %s3484_s15 }
 0xa71   :  { %v721_v60 = vpop.permute.xlu1 %720 }
 0xa72   :  { %v723_v61 = vpop.permute.xlu0 %722  ;;  %v3754_v62 = vadd.f32 %v721_v60, %v706_v58  ;;  %v3807_v58 = vsub.s32 4, %v3660_v25 }
 0xa73   :  { %v3756_v63 = vadd.f32 %v723_v61, %v707_v59 }
 0xa74   :  { %3241 = vtanh.f32 %v3754_v62  ;;  %v844_v48 = vrot.slane %v3754_v62, 7 }
 0xa75   :  { %3243 = vtanh.f32 %v3756_v63  ;;  %v845_v49 = vrot.slane %v3756_v63, 7 }
 0xa81   :  { %v3242_v1 = vpop.eup %3241 }
 0xa82   :  { %v3244_v3 = vpop.eup %3243  ;;  %732 = vrot.lane.b32.xlu1 %v3242_v1, %s3483_s3 }
 0xa83   :  { %734 = vrot.lane.b32.xlu0 %v3244_v3, %s3483_s3 }
 0xaf4   :  { %v733_v6 = vpop.permute.xlu1 %732 }
 0xaf5   :  { %v735_v9 = vpop.permute.xlu0 %734  ;;  %v738_v10 = vmul.f32 %v3238_v46, %v733_v6 }
 0xaf6   :  { %v739_v11 = vmul.f32 %v3240_v47, %v735_v9 }
 0xaf7   :  { %v742_v14 = vrot.slane %v738_v10, 3  ;;  %v1345_v15 = vrot.slane %v738_v10, %v3763_v5 }
 0xaf8   :  { %v743_v16 = vrot.slane %v739_v11, 2  ;;  %v1349_v17 = vrot.slane %v739_v11, %v3763_v5 }
 0xaf9   :  { %v3771_v19 = vsel %vm1341_vm7, %v1345_v15, %v3726_v30 }
 0xafa   :  { %v3776_v20 = vsel %vm1341_vm7, %v1349_v17, %v3731_v31  ;;  %v744_v21 = vsel %vm319_vm2, %v743_v16, %v742_v14 }
 0xafb   :  { %745 = vrot.lane.b32.xlu1 %v744_v21, %s3484_s15 }
 0xb6d   :  { %v746_v22 = vpop.permute.xlu1 %745 }
 0xb6e   :  { %3042 = vmatmul.mubr.msk.f32.vlgmr.msra.gmra.mxu1 %vm186_vm3, %v746_v22 }
 0xb6f   :  { %3056 = vmatpush3.msra.mxu1 %v3565_v2  ;;  %3063 = vmatprep.mubr.msk.f32.mxu1 %vm3482_vm0, %v3481_v0 }
 0xb70   :  { %3057 = vmatprep.subr.mxu1 %v3481_v0 }
 0xb71   :  { %3058 = vmatpush3.msra.mxu1 %v3571_v4 }
 0xb72   :  { %3059 = vmatprep.subr.mxu1 %v3481_v0 }
 0xb73   :  { %3060 = vmatpush3.msra.mxu1 %v3578_v7 }
 0xb74   :  { %3061 = vmatprep.subr.mxu1 %v3481_v0 }
 0xb75   :  { %3062 = vmatpush3.msra.mxu1 %v3584_v8 }
 0xc2e   :  { %v815_v23 = vpop.f32.mrf.mxu1 }
 0xc2f   :  { %v820_v24 = vrot.slane %v815_v23, 4  ;;  %v821_v28 = vrot.slane %v815_v23, 5 }
 0xc30   :  { %v3043_v29 = vpop.f32.mrf.mxu1 }
 0xc31   :  { %v824_v30 = vadd.f32 %v820_v24, %v3617_v13  ;;  %v825_v31 = vadd.f32 %v821_v28, %v3615_v12 }
 0xc33   :  { %v2822_v32 = vmul.f32 -1.442695, %v824_v30  ;;  %v2823_v33 = vmul.f32 -1.442695, %v825_v31 }
 0xc35   :  { %3245 = vpow2.f32 %v2822_v32 }
 0xc36   :  { %3247 = vpow2.f32 %v2823_v33 }
 0xc42   :  { %v3246_v34 = vpop.eup %3245 }
 0xc43   :  { %v3248_v35 = vpop.eup %3247  ;;  %v832_v36 = vadd.f32 1.0, %v3246_v34 }
 0xc44   :  { %v833_v37 = vadd.f32 1.0, %v3248_v35 }
 0xc45   :  { %3249 = vrcp.f32 %v832_v36 }
 0xc46   :  { %3251 = vrcp.f32 %v833_v37 }
 0xc52   :  { %v3250_v38 = vpop.eup %3249 }
 0xc53   :  { %v3252_v39 = vpop.eup %3251  ;;  %v838_v40 = vmul.f32 2.0, %v3250_v38  ;;  %v848_v50 = vmul.f32 %v3250_v38, %v844_v48 }
 0xc54   :  { %v839_v41 = vmul.f32 2.0, %v3252_v39  ;;  %v849_v51 = vmul.f32 %v3252_v39, %v845_v49 }
 0xc55   :  { %v2824_v42 = vadd.f32 -1.0, %v838_v40 }
 0xc56   :  { %v2825_v43 = vadd.f32 -1.0, %v839_v41 }
 0xc57   :  { %852 = vrot.lane.b32.xlu0 %v2824_v42, %s3483_s3 }
 0xc58   :  { %854 = vrot.lane.b32.xlu1 %v2825_v43, %s3483_s3 }
 0xcc9   :  { %v853_v44 = vpop.permute.xlu0 %852 }
 0xcca   :  { %v855_v45 = vpop.permute.xlu1 %854  ;;  %v858_v46 = vmul.f32 %v3250_v38, %v853_v44 }
 0xccb   :  { %v859_v47 = vmul.f32 %v3252_v39, %v855_v45 }
 0xccc   :  { %862 = vrot.lane.b32.xlu0 %v858_v46, %s3484_s15 }
 0xccd   :  { %864 = vrot.lane.b32.xlu1 %v859_v47, %s3484_s15  ;;  %v3846_v47 = vsub.s32 5, %v3660_v25 }
 0xd3e   :  { %v863_v52 = vpop.permute.xlu0 %862 }
 0xd3f   :  { %v865_v53 = vpop.permute.xlu1 %864  ;;  %v3798_v54 = vadd.f32 %v863_v52, %v848_v50 }
 0xd40   :  { %v3800_v55 = vadd.f32 %v865_v53, %v849_v51 }
 0xd41   :  { %3253 = vtanh.f32 %v3798_v54  ;;  %v986_v37 = vrot.slane %v3798_v54, 7 }
 0xd42   :  { %3255 = vtanh.f32 %v3800_v55 }
 0xd4e   :  { %v3254_v56 = vpop.eup %3253 }
 0xd4f   :  { %v3256_v57 = vpop.eup %3255  ;;  %874 = vrot.lane.b32.xlu0 %v3254_v56, %s3483_s3 }
 0xd50   :  { %876 = vrot.lane.b32.xlu1 %v3256_v57, %s3483_s3 }
 0xdc1   :  { %v875_v59 = vpop.permute.xlu0 %874 }
 0xdc2   :  { %v877_v60 = vpop.permute.xlu1 %876  ;;  %v880_v61 = vmul.f32 %v3250_v38, %v875_v59  ;;  %v987_v38 = vrot.slane %v3800_v55, 7 }
 0xdc3   :  { %v881_v62 = vmul.f32 %v3252_v39, %v877_v60 }
 0xdc4   :  { %v884_v63 = vrot.slane %v880_v61, 4  ;;  %v1356_v1 = vrot.slane %v880_v61, %v3807_v58 }
 0xdc5   :  { %v885_v3 = vrot.slane %v881_v62, 3  ;;  %v1360_v6 = vrot.slane %v881_v62, %v3807_v58 }
 0xdc6   :  { %v3815_v9 = vsel %vm1352_vm8, %v1356_v1, %v3771_v19 }
 0xdc7   :  { %v3820_v10 = vsel %vm1352_vm8, %v1360_v6, %v3776_v20  ;;  %v886_v11 = vsel %vm319_vm2, %v885_v3, %v884_v63 }
 0xdc8   :  { %887 = vrot.lane.b32.xlu0 %v886_v11, %s3484_s15 }
 0xe3a   :  { %v888_v14 = vpop.permute.xlu0 %887 }
 0xe3b   :  { %3053 = vmatmul.mubr.msk.f32.vlgmr.msra.gmra.mxu0 %vm186_vm3, %v888_v14 }
 0xe3c   :  { %3067 = vmatpush3.msra.mxu0 %v3565_v2  ;;  %3074 = vmatprep.mubr.msk.f32.mxu0 %vm3482_vm0, %v3481_v0 }
 0xe3d   :  { %3068 = vmatprep.subr.mxu0 %v3481_v0 }
 0xe3e   :  { %3069 = vmatpush3.msra.mxu0 %v3571_v4 }
 0xe3f   :  { %3070 = vmatprep.subr.mxu0 %v3481_v0 }
 0xe40   :  { %3071 = vmatpush3.msra.mxu0 %v3578_v7 }
 0xe41   :  { %3072 = vmatprep.subr.mxu0 %v3481_v0 }
 0xe42   :  { %3073 = vmatpush3.msra.mxu0 %v3584_v8 }
 0xe43   :  { %3088 = vmatprep.subr.mxu0 %v3481_v0 }
 0xefb   :  { %v957_v15 = vpop.f32.mrf.mxu0 }
 0xefc   :  { %v962_v16 = vrot.slane %v957_v15, 3  ;;  %v963_v2 = vrot.slane %v957_v15, 4 }
 0xefd   :  { %v3054_v17 = vpop.f32.mrf.mxu0 }
 0xefe   :  { %v966_v19 = vadd.f32 %v962_v16, %v3617_v13  ;;  %v967_v20 = vadd.f32 %v963_v2, %v3615_v12 }
 0xf00   :  { %v2827_v21 = vmul.f32 -1.442695, %v966_v19  ;;  %v2828_v4 = vmul.f32 -1.442695, %v967_v20 }
 0xf02   :  { %3257 = vpow2.f32 %v2827_v21 }
 0xf03   :  { %3259 = vpow2.f32 %v2828_v4 }
 0xf0f   :  { %v3258_v22 = vpop.eup %3257 }
 0xf10   :  { %v3260_v7 = vpop.eup %3259  ;;  %v974_v23 = vadd.f32 1.0, %v3258_v22 }
 0xf11   :  { %v975_v24 = vadd.f32 1.0, %v3260_v7 }
 0xf12   :  { %3261 = vrcp.f32 %v974_v23 }
 0xf13   :  { %3263 = vrcp.f32 %v975_v24 }
 0xf1f   :  { %v3262_v8 = vpop.eup %3261 }
 0xf20   :  { %v3264_v28 = vpop.eup %3263  ;;  %v980_v29 = vmul.f32 2.0, %v3262_v8  ;;  %v990_v39 = vmul.f32 %v3262_v8, %v986_v37  ;;  %v3869_v37 = vsub.s32 6, %v3660_v25 }
 0xf21   :  { %v981_v30 = vmul.f32 2.0, %v3264_v28  ;;  %v991_v40 = vmul.f32 %v3264_v28, %v987_v38 }
 0xf22   :  { %v2829_v31 = vadd.f32 -1.0, %v980_v29 }
 0xf23   :  { %v2830_v32 = vadd.f32 -1.0, %v981_v30 }
 0xf24   :  { %994 = vrot.lane.b32.xlu1 %v2829_v31, %s3483_s3 }
 0xf25   :  { %996 = vrot.lane.b32.xlu0 %v2830_v32, %s3483_s3 }
 0xf96   :  { %v995_v33 = vpop.permute.xlu1 %994 }
 0xf97   :  { %v997_v34 = vpop.permute.xlu0 %996  ;;  %v1000_v35 = vmul.f32 %v3262_v8, %v995_v33 }
 0xf98   :  { %v1001_v36 = vmul.f32 %v3264_v28, %v997_v34 }
 0xf99   :  { %1004 = vrot.lane.b32.xlu1 %v1000_v35, %s3484_s15 }
 0xf9a   :  { %1006 = vrot.lane.b32.xlu0 %v1001_v36, %s3484_s15 }
0x100b   :  { %v1005_v41 = vpop.permute.xlu1 %1004 }
0x100c   :  { %v1007_v42 = vpop.permute.xlu0 %1006  ;;  %v1010_v43 = vadd.f32 %v1005_v41, %v990_v39 }
0x100d   :  { %v1011_v44 = vadd.f32 %v1007_v42, %v991_v40 }
0x100e   :  { %3265 = vtanh.f32 %v1010_v43 }
0x100f   :  { %3267 = vtanh.f32 %v1011_v44 }
0x101b   :  { %v3266_v45 = vpop.eup %3265 }
0x101c   :  { %v3268_v46 = vpop.eup %3267  ;;  %1016 = vrot.lane.b32.xlu1 %v3266_v45, %s3483_s3 }
0x101d   :  { %1018 = vrot.lane.b32.xlu0 %v3268_v46, %s3483_s3 }
0x108e   :  { %v1017_v48 = vpop.permute.xlu1 %1016 }
0x108f   :  { %v1019_v49 = vpop.permute.xlu0 %1018  ;;  %v1022_v50 = vmul.f32 %v3262_v8, %v1017_v48  ;;  %v1128_v8 = vrot.slane %v1010_v43, 7 }
0x1090   :  { %v1023_v51 = vmul.f32 %v3264_v28, %v1019_v49  ;;  %v1129_v28 = vrot.slane %v1011_v44, 7 }
0x1091   :  { %v1026_v52 = vrot.slane %v1022_v50, 5  ;;  %v1367_v53 = vrot.slane %v1022_v50, %v3846_v47 }
0x1092   :  { %v1027_v54 = vrot.slane %v1023_v51, 4  ;;  %v1371_v55 = vrot.slane %v1023_v51, %v3846_v47 }
0x1093   :  { %v1372_v56 = vsel %vm1363_vm9, %v1367_v53, %v3815_v9 }
0x1094   :  { %v1028_v57 = vsel %vm319_vm2, %v1027_v54, %v1026_v52  ;;  %v1373_v59 = vsel %vm1363_vm9, %v1371_v55, %v3820_v10 }
0x1095   :  { %1029 = vrot.lane.b32.xlu1 %v1028_v57, %s3484_s15 }
0x1107   :  { %v1030_v60 = vpop.permute.xlu1 %1029 }
0x1108   :  { %3064 = vmatmul.mubr.msk.f32.vlgmr.msra.gmra.mxu1 %vm186_vm3, %v1030_v60 }
0x11c8   :  { %v1099_v61 = vpop.f32.mrf.mxu1 }
0x11c9   :  { %v1104_v62 = vrot.slane %v1099_v61, 2  ;;  %v1105_v63 = vrot.slane %v1099_v61, 3 }
0x11ca   :  { %v3065_v1 = vpop.f32.mrf.mxu1 }
0x11cb   :  { %v1108_v3 = vadd.f32 %v1104_v62, %v3617_v13  ;;  %v1109_v6 = vadd.f32 %v1105_v63, %v3615_v12 }
0x11cd   :  { %v2832_v9 = vmul.f32 -1.442695, %v1108_v3  ;;  %v2833_v11 = vmul.f32 -1.442695, %v1109_v6 }
0x11cf   :  { %3269 = vpow2.f32 %v2832_v9 }
0x11d0   :  { %3271 = vpow2.f32 %v2833_v11 }
0x11dc   :  { %v3270_v14 = vpop.eup %3269 }
0x11dd   :  { %v3272_v15 = vpop.eup %3271  ;;  %v1116_v10 = vadd.f32 1.0, %v3270_v14 }
0x11de   :  { %v1117_v16 = vadd.f32 1.0, %v3272_v15 }
0x11df   :  { %3273 = vrcp.f32 %v1116_v10 }
0x11e0   :  { %3275 = vrcp.f32 %v1117_v16 }
0x11ec   :  { %v3274_v2 = vpop.eup %3273 }
0x11ed   :  { %v3276_v17 = vpop.eup %3275  ;;  %v1122_v19 = vmul.f32 2.0, %v3274_v2  ;;  %v1132_v29 = vmul.f32 %v3274_v2, %v1128_v8  ;;  %v1398_v8 = vld [vmem:[#allocation6 + $0x10] sm:$0xff] }
0x11ee   :  { %v1123_v20 = vmul.f32 2.0, %v3276_v17  ;;  %v1133_v30 = vmul.f32 %v3276_v17, %v1129_v28  ;;  %v3909_v28 = vld [vmem:[#allocation7 + $0x8] sm:$0xff] }
0x11ef   :  { %v2834_v21 = vadd.f32 -1.0, %v1122_v19 }
0x11f0   :  { %v2835_v4 = vadd.f32 -1.0, %v1123_v20 }
0x11f1   :  { %1136 = vrot.lane.b32.xlu0 %v2834_v21, %s3483_s3 }
0x11f2   :  { %1138 = vrot.lane.b32.xlu1 %v2835_v4, %s3483_s3 }
0x1263   :  { %v1137_v22 = vpop.permute.xlu0 %1136 }
0x1264   :  { %v1139_v7 = vpop.permute.xlu1 %1138  ;;  %v1142_v23 = vmul.f32 %v3274_v2, %v1137_v22 }
0x1265   :  { %v1143_v24 = vmul.f32 %v3276_v17, %v1139_v7  ;;  %v3903_v7 = vld [vmem:[#allocation7 + $0x18] sm:$0xff] }
0x1266   :  { %1146 = vrot.lane.b32.xlu0 %v1142_v23, %s3484_s15  ;;  %v1399_v23 = vld [vmem:[#allocation6 + $0x18] sm:$0xff] }
0x1267   :  { %1148 = vrot.lane.b32.xlu1 %v1143_v24, %s3484_s15  ;;  %v3905_v24 = vld [vmem:[#allocation7 + $0x10] sm:$0xff]  ;;  %3077 = vmatprep.subr.mxu1 %v1399_v23 }
0x1268   :  { %3078 = vmatpush3.msra.mxu1 %v1399_v23 }
0x1269   :  { %3079 = vmatprep.subr.mxu1 %v1398_v8 }
0x126a   :  { %3080 = vmatpush3.msra.mxu1 %v1398_v8 }
0x12d8   :  { %v1147_v31 = vpop.permute.xlu0 %1146 }
0x12d9   :  { %v1149_v32 = vpop.permute.xlu1 %1148  ;;  %v1152_v33 = vadd.f32 %v1147_v31, %v1132_v29  ;;  %v1397_v29 = vld [vmem:[#allocation6 + $0x8] sm:$0xff]  ;;  %v1396_v31 = vld [vmem:[#allocation6] sm:$0xff] }
0x12da   :  { %v1153_v34 = vadd.f32 %v1149_v32, %v1133_v30  ;;  %v3913_v30 = vld [vmem:[#allocation7] sm:$0xff]  ;;  %3081 = vmatprep.subr.mxu1 %v1397_v29 }
0x12db   :  { %3277 = vtanh.f32 %v1152_v33  ;;  %v1270_v16 = vrot.slane %v1152_v33, 7  ;;  %3082 = vmatpush3.msra.mxu1 %v1397_v29 }
0x12dc   :  { %3279 = vtanh.f32 %v1153_v34  ;;  %3083 = vmatprep.subr.mxu1 %v1396_v31 }
0x12dd   :  { %3084 = vmatpush3.msra.mxu1 %v1396_v31 }
0x12de   :  { %3099 = vmatprep.subr.mxu1 %v3481_v0 }
0x12e8   :  { %v3278_v35 = vpop.eup %3277 }
0x12e9   :  { %v3280_v36 = vpop.eup %3279  ;;  %1158 = vrot.lane.b32.xlu0 %v3278_v35, %s3483_s3 }
0x12ea   :  { %1160 = vrot.lane.b32.xlu1 %v3280_v36, %s3483_s3 }
0x135b   :  { %v1159_v38 = vpop.permute.xlu0 %1158 }
0x135c   :  { %v1161_v39 = vpop.permute.xlu1 %1160  ;;  %v1164_v40 = vmul.f32 %v3274_v2, %v1159_v38  ;;  %v1271_v2 = vrot.slane %v1153_v34, 7  ;;  %v3934_v34 = vsub.s32 7, %v3660_v25 }
0x135d   :  { %v1165_v41 = vmul.f32 %v3276_v17, %v1161_v39 }
0x135e   :  { %v1168_v42 = vrot.slane %v1164_v40, 6  ;;  %v1378_v43 = vrot.slane %v1164_v40, %v3869_v37 }
0x135f   :  { %v1169_v44 = vrot.slane %v1165_v41, 5  ;;  %v1382_v45 = vrot.slane %v1165_v41, %v3869_v37 }
0x1360   :  { %v3876_v46 = vsel %vm1374_vm10, %v1378_v43, %v1372_v56 }
0x1361   :  { %v1170_v48 = vsel %vm319_vm2, %v1169_v44, %v1168_v42  ;;  %v3881_v49 = vsel %vm1374_vm10, %v1382_v45, %v1373_v59 }
0x1362   :  { %1171 = vrot.lane.b32.xlu0 %v1170_v48, %s3484_s15 }
0x13d4   :  { %v1172_v50 = vpop.permute.xlu0 %1171 }
0x13d5   :  { %3075 = vmatmul.mubr.msk.f32.vlgmr.msra.gmra.mxu0 %vm186_vm3, %v1172_v50 }
0x13d6   :  { %3096 = vmatprep.mubr.msk.f32.mxu0 %vm3482_vm0, %v3481_v0  ;;  %3089 = vmatpush3.msra.mxu0 %v3903_v7 }
0x13d7   :  { %3090 = vmatprep.subr.mxu0 %v3481_v0 }
0x13d8   :  { %3091 = vmatpush3.msra.mxu0 %v3905_v24 }
0x13d9   :  { %3092 = vmatprep.subr.mxu0 %v3481_v0 }
0x13da   :  { %3093 = vmatpush3.msra.mxu0 %v3909_v28 }
0x13db   :  { %3094 = vmatprep.subr.mxu0 %v3481_v0 }
0x13dc   :  { %3095 = vmatpush3.msra.mxu0 %v3913_v30 }
0x13dd   :  { %3097 = vmatmul.mubr.f32.vlgmr.msra.gmra.mxu0 %v3481_v0  ;;  %3110 = vmatprep.subr.mxu0 %v3481_v0 }
0x13de   :  { %3111 = vmatpush3.msra.mxu0 %v3903_v7  ;;  %3118 = vmatprep.mubr.msk.f32.mxu0 %vm3482_vm0, %v3481_v0 }
0x13df   :  { %3112 = vmatprep.subr.mxu0 %v3481_v0 }
0x13e0   :  { %3113 = vmatpush3.msra.mxu0 %v3905_v24 }
0x13e1   :  { %3114 = vmatprep.subr.mxu0 %v3481_v0 }
0x13e2   :  { %3115 = vmatpush3.msra.mxu0 %v3909_v28 }
0x13e3   :  { %3116 = vmatprep.subr.mxu0 %v3481_v0 }
0x13e4   :  { %3117 = vmatpush3.msra.mxu0 %v3913_v30 }
0x13e5   :  { %3132 = vmatprep.subr.mxu0 %v3481_v0 }
0x1495   :  { %v1241_v51 = vpop.f32.mrf.mxu0 }
0x1496   :  { %v1246_v52 = vrot.slane %v1241_v51, 1  ;;  %v1247_v53 = vrot.slane %v1241_v51, 2 }
0x1497   :  { %v3076_v54 = vpop.f32.mrf.mxu0 }
0x1498   :  { %v1250_v55 = vadd.f32 %v1246_v52, %v3617_v13  ;;  %v1251_v56 = vadd.f32 %v1247_v53, %v3615_v12 }
0x149a   :  { %v2837_v57 = vmul.f32 -1.442695, %v1250_v55  ;;  %v2838_v60 = vmul.f32 -1.442695, %v1251_v56 }
0x149c   :  { %3281 = vpow2.f32 %v2837_v57 }
0x149d   :  { %3283 = vpow2.f32 %v2838_v60  ;;  %v1562_v44 = vpop.f32.mrf.mxu0 }
0x149f   :  { %v3098_v45 = vpop.f32.mrf.mxu0 }
0x14a9   :  { %v3282_v59 = vpop.eup %3281 }
0x14aa   :  { %v3284_v61 = vpop.eup %3283  ;;  %v1258_v62 = vadd.f32 1.0, %v3282_v59 }
0x14ab   :  { %v1259_v63 = vadd.f32 1.0, %v3284_v61 }
0x14ac   :  { %3285 = vrcp.f32 %v1258_v62 }
0x14ad   :  { %3287 = vrcp.f32 %v1259_v63 }
0x14b9   :  { %v3889_v1 = vpop.eup %3285 }
0x14ba   :  { %v3891_v3 = vpop.eup %3287  ;;  %v1264_v6 = vmul.f32 2.0, %v3889_v1  ;;  %v1274_v17 = vmul.f32 %v3889_v1, %v1270_v16 }
0x14bb   :  { %v1265_v13 = vmul.f32 2.0, %v3891_v3  ;;  %v1275_v19 = vmul.f32 %v3891_v3, %v1271_v2 }
0x14bc   :  { %v2839_v9 = vadd.f32 -1.0, %v1264_v6 }
0x14bd   :  { %v2840_v12 = vadd.f32 -1.0, %v1265_v13 }
0x14be   :  { %1278 = vrot.lane.b32.xlu1 %v2839_v9, %s3483_s3 }
0x14bf   :  { %1280 = vrot.lane.b32.xlu0 %v2840_v12, %s3483_s3 }
0x1530   :  { %v1279_v11 = vpop.permute.xlu1 %1278 }
0x1531   :  { %v1281_v14 = vpop.permute.xlu0 %1280  ;;  %v1284_v15 = vmul.f32 %v3889_v1, %v1279_v11 }
0x1532   :  { %v1285_v10 = vmul.f32 %v3891_v3, %v1281_v14 }
0x1533   :  { %1288 = vrot.lane.b32.xlu1 %v1284_v15, %s3484_s15 }
0x1534   :  { %1290 = vrot.lane.b32.xlu0 %v1285_v10, %s3484_s15 }
0x15a5   :  { %v1289_v20 = vpop.permute.xlu1 %1288 }
0x15a6   :  { %v1291_v21 = vpop.permute.xlu0 %1290  ;;  %v1294_v4 = vadd.f32 %v1289_v20, %v1274_v17 }
0x15a7   :  { %v1295_v22 = vadd.f32 %v1291_v21, %v1275_v19 }
0x15a8   :  { %3289 = vtanh.f32 %v1294_v4 }
0x15a9   :  { %3291 = vtanh.f32 %v1295_v22 }
0x15b5   :  { %v3290_v32 = vpop.eup %3289 }
0x15b6   :  { %v3292_v33 = vpop.eup %3291  ;;  %1300 = vrot.lane.b32.xlu1 %v3290_v32, %s3483_s3 }
0x15b7   :  { %1302 = vrot.lane.b32.xlu0 %v3292_v33, %s3483_s3 }
0x1628   :  { %v1301_v35 = vpop.permute.xlu1 %1300 }
0x1629   :  { %v1303_v36 = vpop.permute.xlu0 %1302  ;;  %v1306_v38 = vmul.f32 %v3889_v1, %v1301_v35 }
0x162a   :  { %v1307_v39 = vmul.f32 %v3891_v3, %v1303_v36 }
0x162b   :  { %v1389_v40 = vrot.slane %v1306_v38, %v3934_v34 }
0x162c   :  { %v1393_v41 = vrot.slane %v1307_v39, %v3934_v34 }
0x162d   :  { %v1394_v42 = vsel %vm1385_vm11, %v1389_v40, %v3876_v46  ;;  %v2841_v46 = vld [vmem:[%s4250_s6] ss:$0 sm:$0xff] }
0x162e   :  { %v1395_v43 = vsel %vm1385_vm11, %v1393_v41, %v3881_v49  ;;  %1409 = vrot.lane.b32.xlu1 %v1394_v42, %s3484_s15  ;;  %v1567_v49 = vrot.slane %v1562_v44, 1 }
0x162f   :  { %1411 = vrot.lane.b32.xlu0 %v1395_v43, %s3484_s15 }
0x16a0   :  { %v1410_v48 = vpop.permute.xlu1 %1409 }
0x16a1   :  { %v1412_v50 = vpop.permute.xlu0 %1411  ;;  %3085 = vmatprep.mubr.msk.f32.mxu1 %vm186_vm3, %v1410_v48 }
0x16a2   :  { %3086 = vmatmul.mubr.msk.f32.vlgmr.msra.gmra.mxu1 %vm186_vm3, %v1412_v50 }
0x16a3   :  { %3100 = vmatpush3.msra.mxu1 %v3903_v7  ;;  %3107 = vmatprep.mubr.msk.f32.mxu1 %vm3482_vm0, %v3481_v0 }
0x16a4   :  { %3101 = vmatprep.subr.mxu1 %v3481_v0 }
0x16a5   :  { %3102 = vmatpush3.msra.mxu1 %v3905_v24 }
0x16a6   :  { %3103 = vmatprep.subr.mxu1 %v3481_v0 }
0x16a7   :  { %3104 = vmatpush3.msra.mxu1 %v3909_v28 }
0x16a8   :  { %3105 = vmatprep.subr.mxu1 %v3481_v0 }
0x16a9   :  { %3106 = vmatpush3.msra.mxu1 %v3913_v30 }
0x16aa   :  { %3121 = vmatprep.subr.mxu1 %v3481_v0 }
0x1762   :  { %v3087_v51 = vpop.f32.mrf.mxu1 }
0x1763   :  { %v3964_v52 = vadd.f32 %v3087_v51, %v2841_v46 }
0x1764   :  { %v1483_v53 = vpop.f32.mrf.mxu1 }
0x1765   :  { %v1571_v54 = vadd.f32 %v1567_v49, %v3964_v52  ;;  %v3967_v55 = vadd.f32 %v2841_v46, %v1483_v53 }
0x1767   :  { %v2845_v56 = vmul.f32 -1.442695, %v1571_v54  ;;  %v1570_v57 = vadd.f32 %v1562_v44, %v3967_v55 }
0x1769   :  { %3293 = vpow2.f32 %v2845_v56  ;;  %v2844_v60 = vmul.f32 -1.442695, %v1570_v57 }
0x176b   :  { %3295 = vpow2.f32 %v2844_v60 }
0x1776   :  { %v3294_v59 = vpop.eup %3293 }
0x1777   :  { %v1579_v61 = vadd.f32 1.0, %v3294_v59 }
0x1778   :  { %v3296_v62 = vpop.eup %3295 }
0x1779   :  { %3297 = vrcp.f32 %v1579_v61  ;;  %v1578_v63 = vadd.f32 1.0, %v3296_v62 }
0x177b   :  { %3299 = vrcp.f32 %v1578_v63 }
0x1786   :  { %v3298_v1 = vpop.eup %3297 }
0x1787   :  { %v1585_v3 = vmul.f32 2.0, %v3298_v1  ;;  %v1589_v16 = vmul.f32 0.0, %v3298_v1 }
0x1788   :  { %v3300_v6 = vpop.eup %3299 }
0x1789   :  { %v2847_v13 = vadd.f32 -1.0, %v1585_v3  ;;  %v1584_v9 = vmul.f32 2.0, %v3300_v6  ;;  %v1588_v19 = vmul.f32 0.0, %v3300_v6 }
0x178b   :  { %1594 = vrot.lane.b32.xlu1 %v2847_v13, %s3483_s3  ;;  %v2846_v12 = vadd.f32 -1.0, %v1584_v9 }
0x178d   :  { %1592 = vrot.lane.b32.xlu0 %v2846_v12, %s3483_s3 }
0x17fd   :  { %v1595_v11 = vpop.permute.xlu1 %1594 }
0x17fe   :  { %v1599_v14 = vmul.f32 %v3298_v1, %v1595_v11 }
0x17ff   :  { %v1593_v15 = vpop.permute.xlu0 %1592 }
0x1800   :  { %v1598_v10 = vmul.f32 %v3300_v6, %v1593_v15  ;;  %1604 = vrot.lane.b32.xlu1 %v1599_v14, %s3484_s15 }
0x1802   :  { %1602 = vrot.lane.b32.xlu0 %v1598_v10, %s3484_s15 }
0x1872   :  { %v1605_v2 = vpop.permute.xlu1 %1604 }
0x1873   :  { %v1609_v17 = vadd.f32 %v1605_v2, %v1589_v16 }
0x1874   :  { %v1603_v20 = vpop.permute.xlu0 %1602 }
0x1875   :  { %3301 = vtanh.f32 %v1609_v17  ;;  %v1608_v21 = vadd.f32 %v1603_v20, %v1588_v19  ;;  %v1725_v62 = vrot.slane %v1609_v17, 7 }
0x1877   :  { %3303 = vtanh.f32 %v1608_v21  ;;  %v1724_v63 = vrot.slane %v1608_v21, 7 }
0x1882   :  { %v3302_v4 = vpop.eup %3301 }
0x1883   :  { %1616 = vrot.lane.b32.xlu1 %v3302_v4, %s3483_s3 }
0x1884   :  { %v3304_v22 = vpop.eup %3303 }
0x1885   :  { %1614 = vrot.lane.b32.xlu0 %v3304_v22, %s3483_s3 }
0x18f5   :  { %v1617_v23 = vpop.permute.xlu1 %1616 }
0x18f6   :  { %v3976_v8 = vmul.f32 %v3298_v1, %v1617_v23 }
0x18f7   :  { %v1615_v29 = vpop.permute.xlu0 %1614 }
0x18f8   :  { %v1624_v31 = vrot.slane %v3976_v8, 7  ;;  %v3979_v32 = vmul.f32 %v3300_v6, %v1615_v29  ;;  %v2620_v15 = vrot.slane %v3976_v8, %v3663_v26 }
0x18fa   :  { %v1625_v33 = vsel %vm319_vm2, %v1624_v31, %v3979_v32  ;;  %v2616_v2 = vrot.slane %v3979_v32, %v3663_v26  ;;  %v2622_v21 = vsel %vm1308_vm4, %v2620_v15, 0.0 }
0x18fb   :  { %1626 = vrot.lane.b32.xlu1 %v1625_v33, %s3484_s15 }
0x18fc   :  { %v2621_v8 = vsel %vm1308_vm4, %v2616_v2, 0.0 }
0x196d   :  { %v1627_v35 = vpop.permute.xlu1 %1626 }
0x196e   :  { %3108 = vmatmul.mubr.msk.f32.vlgmr.msra.gmra.mxu1 %vm186_vm3, %v1627_v35 }
0x196f   :  { %3122 = vmatpush3.msra.mxu1 %v3903_v7  ;;  %3129 = vmatprep.mubr.msk.f32.mxu1 %vm3482_vm0, %v3481_v0 }
0x1970   :  { %3123 = vmatprep.subr.mxu1 %v3481_v0 }
0x1971   :  { %3124 = vmatpush3.msra.mxu1 %v3905_v24 }
0x1972   :  { %3125 = vmatprep.subr.mxu1 %v3481_v0 }
0x1973   :  { %3126 = vmatpush3.msra.mxu1 %v3909_v28 }
0x1974   :  { %3127 = vmatprep.subr.mxu1 %v3481_v0 }
0x1975   :  { %3128 = vmatpush3.msra.mxu1 %v3913_v30 }
0x1976   :  { %3143 = vmatprep.subr.mxu1 %v3481_v0 }
0x1a2e   :  { %v1696_v36 = vpop.f32.mrf.mxu1 }
0x1a2f   :  { %v1701_v38 = vrot.slane %v1696_v36, 7  ;;  %v1705_v39 = vadd.f32 %v1696_v36, %v3964_v52 }
0x1a30   :  { %v3109_v40 = vpop.f32.mrf.mxu1 }
0x1a31   :  { %v1704_v41 = vadd.f32 %v1701_v38, %v3967_v55  ;;  %v2850_v42 = vmul.f32 -1.442695, %v1705_v39 }
0x1a33   :  { %v2849_v43 = vmul.f32 -1.442695, %v1704_v41  ;;  %3305 = vpow2.f32 %v2850_v42 }
0x1a35   :  { %3307 = vpow2.f32 %v2849_v43 }
0x1a40   :  { %v3306_v44 = vpop.eup %3305 }
0x1a41   :  { %v1713_v45 = vadd.f32 1.0, %v3306_v44 }
0x1a42   :  { %v3308_v48 = vpop.eup %3307 }
0x1a43   :  { %v1712_v50 = vadd.f32 1.0, %v3308_v48  ;;  %3309 = vrcp.f32 %v1713_v45 }
0x1a45   :  { %3311 = vrcp.f32 %v1712_v50 }
0x1a50   :  { %v3310_v46 = vpop.eup %3309 }
0x1a51   :  { %v1719_v49 = vmul.f32 2.0, %v3310_v46  ;;  %v1729_v1 = vmul.f32 %v3310_v46, %v1725_v62 }
0x1a52   :  { %v3312_v51 = vpop.eup %3311 }
0x1a53   :  { %v2852_v53 = vadd.f32 -1.0, %v1719_v49  ;;  %v1718_v54 = vmul.f32 2.0, %v3312_v51  ;;  %v1728_v13 = vmul.f32 %v3312_v51, %v1724_v63 }
0x1a55   :  { %1734 = vrot.lane.b32.xlu1 %v2852_v53, %s3483_s3  ;;  %v2851_v56 = vadd.f32 -1.0, %v1718_v54 }
0x1a57   :  { %1732 = vrot.lane.b32.xlu0 %v2851_v56, %s3483_s3 }
0x1ac7   :  { %v1735_v57 = vpop.permute.xlu1 %1734 }
0x1ac8   :  { %v1739_v60 = vmul.f32 %v3310_v46, %v1735_v57 }
0x1ac9   :  { %v1733_v59 = vpop.permute.xlu0 %1732 }
0x1aca   :  { %v1738_v61 = vmul.f32 %v3312_v51, %v1733_v59  ;;  %1744 = vrot.lane.b32.xlu1 %v1739_v60, %s3484_s15 }
0x1acc   :  { %1742 = vrot.lane.b32.xlu0 %v1738_v61, %s3484_s15 }
0x1b3c   :  { %v1745_v3 = vpop.permute.xlu1 %1744 }
0x1b3d   :  { %v4001_v6 = vadd.f32 %v1745_v3, %v1729_v1 }
0x1b3e   :  { %v1743_v9 = vpop.permute.xlu0 %1742 }
0x1b3f   :  { %3313 = vtanh.f32 %v4001_v6  ;;  %v4004_v12 = vadd.f32 %v1743_v9, %v1728_v13  ;;  %v1866_v59 = vrot.slane %v4001_v6, 7 }
0x1b41   :  { %3315 = vtanh.f32 %v4004_v12  ;;  %v1865_v60 = vrot.slane %v4004_v12, 7 }
0x1b4c   :  { %v3314_v11 = vpop.eup %3313 }
0x1b4d   :  { %1756 = vrot.lane.b32.xlu1 %v3314_v11, %s3483_s3 }
0x1b4e   :  { %v3316_v14 = vpop.eup %3315 }
0x1b4f   :  { %1754 = vrot.lane.b32.xlu0 %v3316_v14, %s3483_s3 }
0x1bbf   :  { %v1757_v10 = vpop.permute.xlu1 %1756 }
0x1bc0   :  { %v1761_v16 = vmul.f32 %v3310_v46, %v1757_v10 }
0x1bc1   :  { %v1755_v17 = vpop.permute.xlu0 %1754 }
0x1bc2   :  { %v2630_v19 = vrot.slane %v1761_v16, %v3666_v27  ;;  %v1760_v20 = vmul.f32 %v3312_v51, %v1755_v17 }
0x1bc4   :  { %v4018_v4 = vsel %vm1319_vm5, %v2630_v19, %v2622_v21  ;;  %v1764_v22 = vrot.slane %v1760_v20, 1  ;;  %v2626_v23 = vrot.slane %v1760_v20, %v3666_v27 }
0x1bc6   :  { %v4025_v26 = vsel %vm1319_vm5, %v2626_v23, %v2621_v8  ;;  %v1765_v29 = vsel %vm319_vm2, %v1761_v16, %v1764_v22 }
0x1bc7   :  { %1766 = vrot.lane.b32.xlu0 %v1765_v29, %s3484_s15 }
0x1c39   :  { %v1767_v31 = vpop.permute.xlu0 %1766 }
0x1c3a   :  { %3119 = vmatmul.mubr.msk.f32.vlgmr.msra.gmra.mxu0 %vm186_vm3, %v1767_v31 }
0x1c3b   :  { %3133 = vmatpush3.msra.mxu0 %v3903_v7  ;;  %3140 = vmatprep.mubr.msk.f32.mxu0 %vm3482_vm0, %v3481_v0 }
0x1c3c   :  { %3134 = vmatprep.subr.mxu0 %v3481_v0 }
0x1c3d   :  { %3135 = vmatpush3.msra.mxu0 %v3905_v24 }
0x1c3e   :  { %3136 = vmatprep.subr.mxu0 %v3481_v0 }
0x1c3f   :  { %3137 = vmatpush3.msra.mxu0 %v3909_v28 }
0x1c40   :  { %3138 = vmatprep.subr.mxu0 %v3481_v0 }
0x1c41   :  { %3139 = vmatpush3.msra.mxu0 %v3913_v30 }
0x1c42   :  { %3154 = vmatprep.subr.mxu0 %v3481_v0 }
0x1cfa   :  { %v1836_v27 = vpop.f32.mrf.mxu0 }
0x1cfb   :  { %v1841_v32 = vrot.slane %v1836_v27, 6  ;;  %v1842_v33 = vrot.slane %v1836_v27, 7 }
0x1cfc   :  { %v3120_v35 = vpop.f32.mrf.mxu0 }
0x1cfd   :  { %v1845_v36 = vadd.f32 %v1841_v32, %v3967_v55  ;;  %v1846_v38 = vadd.f32 %v1842_v33, %v3964_v52 }
0x1cff   :  { %v2854_v39 = vmul.f32 -1.442695, %v1845_v36  ;;  %v2855_v40 = vmul.f32 -1.442695, %v1846_v38 }
0x1d01   :  { %3317 = vpow2.f32 %v2854_v39 }
0x1d02   :  { %3319 = vpow2.f32 %v2855_v40 }
0x1d0e   :  { %v3318_v41 = vpop.eup %3317 }
0x1d0f   :  { %v3320_v42 = vpop.eup %3319  ;;  %v1853_v43 = vadd.f32 1.0, %v3318_v41 }
0x1d10   :  { %v1854_v44 = vadd.f32 1.0, %v3320_v42 }
0x1d11   :  { %3321 = vrcp.f32 %v1853_v43 }
0x1d12   :  { %3323 = vrcp.f32 %v1854_v44 }
0x1d1e   :  { %v3322_v45 = vpop.eup %3321 }
0x1d1f   :  { %v3324_v48 = vpop.eup %3323  ;;  %v1859_v50 = vmul.f32 2.0, %v3322_v45  ;;  %v1869_v61 = vmul.f32 %v3322_v45, %v1865_v60 }
0x1d20   :  { %v1860_v46 = vmul.f32 2.0, %v3324_v48  ;;  %v1870_v62 = vmul.f32 %v3324_v48, %v1866_v59 }
0x1d21   :  { %v2856_v49 = vadd.f32 -1.0, %v1859_v50 }
0x1d22   :  { %v2857_v51 = vadd.f32 -1.0, %v1860_v46 }
0x1d23   :  { %1873 = vrot.lane.b32.xlu1 %v2856_v49, %s3483_s3 }
0x1d24   :  { %1875 = vrot.lane.b32.xlu0 %v2857_v51, %s3483_s3 }
0x1d95   :  { %v1874_v53 = vpop.permute.xlu1 %1873 }
0x1d96   :  { %v1876_v54 = vpop.permute.xlu0 %1875  ;;  %v1879_v56 = vmul.f32 %v3322_v45, %v1874_v53 }
0x1d97   :  { %v1880_v57 = vmul.f32 %v3324_v48, %v1876_v54 }
0x1d98   :  { %1883 = vrot.lane.b32.xlu1 %v1879_v56, %s3484_s15 }
0x1d99   :  { %1885 = vrot.lane.b32.xlu0 %v1880_v57, %s3484_s15 }
0x1e0a   :  { %v1884_v63 = vpop.permute.xlu1 %1883 }
0x1e0b   :  { %v1886_v1 = vpop.permute.xlu0 %1885  ;;  %v4048_v3 = vadd.f32 %v1884_v63, %v1869_v61 }
0x1e0c   :  { %v4050_v13 = vadd.f32 %v1886_v1, %v1870_v62 }
0x1e0d   :  { %3325 = vtanh.f32 %v4048_v3  ;;  %v2007_v46 = vrot.slane %v4048_v3, 7 }
0x1e0e   :  { %3327 = vtanh.f32 %v4050_v13  ;;  %v2008_v49 = vrot.slane %v4050_v13, 7 }
0x1e1a   :  { %v3326_v9 = vpop.eup %3325 }
0x1e1b   :  { %v3328_v11 = vpop.eup %3327  ;;  %1895 = vrot.lane.b32.xlu1 %v3326_v9, %s3483_s3 }
0x1e1c   :  { %1897 = vrot.lane.b32.xlu0 %v3328_v11, %s3483_s3 }
0x1e8d   :  { %v1896_v12 = vpop.permute.xlu1 %1895 }
0x1e8e   :  { %v1898_v6 = vpop.permute.xlu0 %1897  ;;  %v1901_v14 = vmul.f32 %v3322_v45, %v1896_v12 }
0x1e8f   :  { %v1902_v15 = vmul.f32 %v3324_v48, %v1898_v6 }
0x1e90   :  { %v1905_v10 = vrot.slane %v1901_v14, 2  ;;  %v2636_v16 = vrot.slane %v1901_v14, %v3718_v18 }
0x1e91   :  { %v1906_v2 = vrot.slane %v1902_v15, 1  ;;  %v2640_v17 = vrot.slane %v1902_v15, %v3718_v18 }
0x1e92   :  { %v4061_v19 = vsel %vm1330_vm6, %v2636_v16, %v4025_v26 }
0x1e93   :  { %v4066_v20 = vsel %vm1330_vm6, %v2640_v17, %v4018_v4  ;;  %v1907_v21 = vsel %vm319_vm2, %v1906_v2, %v1905_v10 }
0x1e94   :  { %1908 = vrot.lane.b32.xlu1 %v1907_v21, %s3484_s15 }
0x1f06   :  { %v1909_v22 = vpop.permute.xlu1 %1908 }
0x1f07   :  { %3130 = vmatmul.mubr.msk.f32.vlgmr.msra.gmra.mxu1 %vm186_vm3, %v1909_v22 }
0x1f08   :  { %3144 = vmatpush3.msra.mxu1 %v3903_v7  ;;  %3151 = vmatprep.mubr.msk.f32.mxu1 %vm3482_vm0, %v3481_v0 }
0x1f09   :  { %3145 = vmatprep.subr.mxu1 %v3481_v0 }
0x1f0a   :  { %3146 = vmatpush3.msra.mxu1 %v3905_v24 }
0x1f0b   :  { %3147 = vmatprep.subr.mxu1 %v3481_v0 }
0x1f0c   :  { %3148 = vmatpush3.msra.mxu1 %v3909_v28 }
0x1f0d   :  { %3149 = vmatprep.subr.mxu1 %v3481_v0 }
0x1f0e   :  { %3150 = vmatpush3.msra.mxu1 %v3913_v30 }
0x1f0f   :  { %3165 = vmatprep.subr.mxu1 %v3481_v0 }
0x1fc7   :  { %v1978_v18 = vpop.f32.mrf.mxu1 }
0x1fc8   :  { %v1983_v4 = vrot.slane %v1978_v18, 5  ;;  %v1984_v23 = vrot.slane %v1978_v18, 6 }
0x1fc9   :  { %v3131_v8 = vpop.f32.mrf.mxu1 }
0x1fca   :  { %v1987_v26 = vadd.f32 %v1983_v4, %v3967_v55  ;;  %v1988_v29 = vadd.f32 %v1984_v23, %v3964_v52 }
0x1fcc   :  { %v2859_v31 = vmul.f32 -1.442695, %v1987_v26  ;;  %v2860_v27 = vmul.f32 -1.442695, %v1988_v29 }
0x1fce   :  { %3329 = vpow2.f32 %v2859_v31 }
0x1fcf   :  { %3331 = vpow2.f32 %v2860_v27 }
0x1fdb   :  { %v3330_v32 = vpop.eup %3329 }
0x1fdc   :  { %v3332_v33 = vpop.eup %3331  ;;  %v1995_v35 = vadd.f32 1.0, %v3330_v32 }
0x1fdd   :  { %v1996_v36 = vadd.f32 1.0, %v3332_v33 }
0x1fde   :  { %3333 = vrcp.f32 %v1995_v35 }
0x1fdf   :  { %3335 = vrcp.f32 %v1996_v36 }
0x1feb   :  { %v3334_v38 = vpop.eup %3333 }
0x1fec   :  { %v3336_v39 = vpop.eup %3335  ;;  %v2001_v40 = vmul.f32 2.0, %v3334_v38  ;;  %v2011_v51 = vmul.f32 %v3334_v38, %v2007_v46 }
0x1fed   :  { %v2002_v41 = vmul.f32 2.0, %v3336_v39  ;;  %v2012_v53 = vmul.f32 %v3336_v39, %v2008_v49 }
0x1fee   :  { %v2861_v42 = vadd.f32 -1.0, %v2001_v40 }
0x1fef   :  { %v2862_v43 = vadd.f32 -1.0, %v2002_v41 }
0x1ff0   :  { %2015 = vrot.lane.b32.xlu0 %v2861_v42, %s3483_s3 }
0x1ff1   :  { %2017 = vrot.lane.b32.xlu1 %v2862_v43, %s3483_s3 }
0x2062   :  { %v2016_v44 = vpop.permute.xlu0 %2015 }
0x2063   :  { %v2018_v45 = vpop.permute.xlu1 %2017  ;;  %v2021_v48 = vmul.f32 %v3334_v38, %v2016_v44 }
0x2064   :  { %v2022_v50 = vmul.f32 %v3336_v39, %v2018_v45 }
0x2065   :  { %2025 = vrot.lane.b32.xlu0 %v2021_v48, %s3484_s15 }
0x2066   :  { %2027 = vrot.lane.b32.xlu1 %v2022_v50, %s3484_s15 }
0x20d7   :  { %v2026_v54 = vpop.permute.xlu0 %2025 }
0x20d8   :  { %v2028_v56 = vpop.permute.xlu1 %2027  ;;  %v4089_v57 = vadd.f32 %v2026_v54, %v2011_v51 }
0x20d9   :  { %v4091_v60 = vadd.f32 %v2028_v56, %v2012_v53 }
0x20da   :  { %3337 = vtanh.f32 %v4089_v57  ;;  %v2149_v40 = vrot.slane %v4089_v57, 7 }
0x20db   :  { %3339 = vtanh.f32 %v4091_v60  ;;  %v2150_v41 = vrot.slane %v4091_v60, 7 }
0x20e7   :  { %v3338_v59 = vpop.eup %3337 }
0x20e8   :  { %v3340_v61 = vpop.eup %3339  ;;  %2037 = vrot.lane.b32.xlu0 %v3338_v59, %s3483_s3 }
0x20e9   :  { %2039 = vrot.lane.b32.xlu1 %v3340_v61, %s3483_s3 }
0x215a   :  { %v2038_v62 = vpop.permute.xlu0 %2037 }
0x215b   :  { %v2040_v63 = vpop.permute.xlu1 %2039  ;;  %v2043_v1 = vmul.f32 %v3334_v38, %v2038_v62 }
0x215c   :  { %v2044_v3 = vmul.f32 %v3336_v39, %v2040_v63 }
0x215d   :  { %v2047_v13 = vrot.slane %v2043_v1, 3  ;;  %v2646_v9 = vrot.slane %v2043_v1, %v3763_v5 }
0x215e   :  { %v2048_v11 = vrot.slane %v2044_v3, 2  ;;  %v2650_v12 = vrot.slane %v2044_v3, %v3763_v5 }
0x215f   :  { %v4102_v6 = vsel %vm1341_vm7, %v2646_v9, %v4061_v19 }
0x2160   :  { %v4107_v14 = vsel %vm1341_vm7, %v2650_v12, %v4066_v20  ;;  %v2049_v15 = vsel %vm319_vm2, %v2048_v11, %v2047_v13 }
0x2161   :  { %2050 = vrot.lane.b32.xlu0 %v2049_v15, %s3484_s15 }
0x21d3   :  { %v2051_v10 = vpop.permute.xlu0 %2050 }
0x21d4   :  { %3141 = vmatmul.mubr.msk.f32.vlgmr.msra.gmra.mxu0 %vm186_vm3, %v2051_v10 }
0x21d5   :  { %3155 = vmatpush3.msra.mxu0 %v3903_v7  ;;  %3162 = vmatprep.mubr.msk.f32.mxu0 %vm3482_vm0, %v3481_v0 }
0x21d6   :  { %3156 = vmatprep.subr.mxu0 %v3481_v0 }
0x21d7   :  { %3157 = vmatpush3.msra.mxu0 %v3905_v24 }
0x21d8   :  { %3158 = vmatprep.subr.mxu0 %v3481_v0 }
0x21d9   :  { %3159 = vmatpush3.msra.mxu0 %v3909_v28 }
0x21da   :  { %3160 = vmatprep.subr.mxu0 %v3481_v0 }
0x21db   :  { %3161 = vmatpush3.msra.mxu0 %v3913_v30 }
0x2294   :  { %v2120_v5 = vpop.f32.mrf.mxu0 }
0x2295   :  { %v2125_v16 = vrot.slane %v2120_v5, 4  ;;  %v2126_v2 = vrot.slane %v2120_v5, 5 }
0x2296   :  { %v3142_v17 = vpop.f32.mrf.mxu0 }
0x2297   :  { %v2129_v19 = vadd.f32 %v2125_v16, %v3967_v55  ;;  %v2130_v20 = vadd.f32 %v2126_v2, %v3964_v52 }
0x2299   :  { %v2864_v21 = vmul.f32 -1.442695, %v2129_v19  ;;  %v2865_v22 = vmul.f32 -1.442695, %v2130_v20 }
0x229b   :  { %3341 = vpow2.f32 %v2864_v21 }
0x229c   :  { %3343 = vpow2.f32 %v2865_v22 }
0x22a8   :  { %v3342_v18 = vpop.eup %3341 }
0x22a9   :  { %v3344_v4 = vpop.eup %3343  ;;  %v2137_v23 = vadd.f32 1.0, %v3342_v18 }
0x22aa   :  { %v2138_v8 = vadd.f32 1.0, %v3344_v4 }
0x22ab   :  { %3345 = vrcp.f32 %v2137_v23 }
0x22ac   :  { %3347 = vrcp.f32 %v2138_v8 }
0x22b8   :  { %v3346_v26 = vpop.eup %3345 }
0x22b9   :  { %v3348_v29 = vpop.eup %3347  ;;  %v2143_v31 = vmul.f32 2.0, %v3346_v26  ;;  %v2153_v42 = vmul.f32 %v3346_v26, %v2149_v40 }
0x22ba   :  { %v2144_v27 = vmul.f32 2.0, %v3348_v29  ;;  %v2154_v43 = vmul.f32 %v3348_v29, %v2150_v41 }
0x22bb   :  { %v2866_v32 = vadd.f32 -1.0, %v2143_v31 }
0x22bc   :  { %v2867_v33 = vadd.f32 -1.0, %v2144_v27 }
0x22bd   :  { %2157 = vrot.lane.b32.xlu1 %v2866_v32, %s3483_s3 }
0x22be   :  { %2159 = vrot.lane.b32.xlu0 %v2867_v33, %s3483_s3 }
0x232f   :  { %v2158_v35 = vpop.permute.xlu1 %2157 }
0x2330   :  { %v2160_v36 = vpop.permute.xlu0 %2159  ;;  %v2163_v38 = vmul.f32 %v3346_v26, %v2158_v35 }
0x2331   :  { %v2164_v39 = vmul.f32 %v3348_v29, %v2160_v36 }
0x2332   :  { %2167 = vrot.lane.b32.xlu1 %v2163_v38, %s3484_s15 }
0x2333   :  { %2169 = vrot.lane.b32.xlu0 %v2164_v39, %s3484_s15 }
0x23a4   :  { %v2168_v44 = vpop.permute.xlu1 %2167 }
0x23a5   :  { %v2170_v45 = vpop.permute.xlu0 %2169  ;;  %v4129_v48 = vadd.f32 %v2168_v44, %v2153_v42 }
0x23a6   :  { %v4131_v50 = vadd.f32 %v2170_v45, %v2154_v43 }
0x23a7   :  { %3349 = vtanh.f32 %v4129_v48  ;;  %v2291_v18 = vrot.slane %v4129_v48, 7 }
0x23a8   :  { %3351 = vtanh.f32 %v4131_v50  ;;  %v2292_v4 = vrot.slane %v4131_v50, 7 }
0x23b4   :  { %v3350_v46 = vpop.eup %3349 }
0x23b5   :  { %v3352_v49 = vpop.eup %3351  ;;  %2179 = vrot.lane.b32.xlu1 %v3350_v46, %s3483_s3 }
0x23b6   :  { %2181 = vrot.lane.b32.xlu0 %v3352_v49, %s3483_s3 }
0x2427   :  { %v2180_v51 = vpop.permute.xlu1 %2179 }
0x2428   :  { %v2182_v53 = vpop.permute.xlu0 %2181  ;;  %v2185_v54 = vmul.f32 %v3346_v26, %v2180_v51 }
0x2429   :  { %v2186_v56 = vmul.f32 %v3348_v29, %v2182_v53 }
0x242a   :  { %v2189_v57 = vrot.slane %v2185_v54, 4  ;;  %v2656_v60 = vrot.slane %v2185_v54, %v3807_v58 }
0x242b   :  { %v2190_v59 = vrot.slane %v2186_v56, 3  ;;  %v2660_v61 = vrot.slane %v2186_v56, %v3807_v58 }
0x242c   :  { %v4142_v62 = vsel %vm1352_vm8, %v2656_v60, %v4102_v6 }
0x242d   :  { %v4147_v63 = vsel %vm1352_vm8, %v2660_v61, %v4107_v14  ;;  %v2191_v1 = vsel %vm319_vm2, %v2190_v59, %v2189_v57 }
0x242e   :  { %2192 = vrot.lane.b32.xlu1 %v2191_v1, %s3484_s15 }
0x24a0   :  { %v2193_v3 = vpop.permute.xlu1 %2192 }
0x24a1   :  { %3152 = vmatmul.mubr.msk.f32.vlgmr.msra.gmra.mxu1 %vm186_vm3, %v2193_v3 }
0x24a2   :  { %3166 = vmatpush3.msra.mxu1 %v3903_v7  ;;  %3173 = vmatprep.mubr.msk.f32.mxu1 %vm3482_vm0, %v3481_v0 }
0x24a3   :  { %3167 = vmatprep.subr.mxu1 %v3481_v0 }
0x24a4   :  { %3168 = vmatpush3.msra.mxu1 %v3905_v24 }
0x24a5   :  { %3169 = vmatprep.subr.mxu1 %v3481_v0 }
0x24a6   :  { %3170 = vmatpush3.msra.mxu1 %v3909_v28 }
0x24a7   :  { %3171 = vmatprep.subr.mxu1 %v3481_v0 }
0x24a8   :  { %3172 = vmatpush3.msra.mxu1 %v3913_v30 }
0x2561   :  { %v2262_v58 = vpop.f32.mrf.mxu1 }
0x2562   :  { %v2267_v13 = vrot.slane %v2262_v58, 3  ;;  %v2268_v9 = vrot.slane %v2262_v58, 4 }
0x2563   :  { %v3153_v11 = vpop.f32.mrf.mxu1 }
0x2564   :  { %v2271_v7 = vadd.f32 %v2267_v13, %v3967_v55  ;;  %v2272_v12 = vadd.f32 %v2268_v9, %v3964_v52 }
0x2566   :  { %v2869_v6 = vmul.f32 -1.442695, %v2271_v7  ;;  %v2870_v14 = vmul.f32 -1.442695, %v2272_v12 }
0x2568   :  { %3353 = vpow2.f32 %v2869_v6 }
0x2569   :  { %3355 = vpow2.f32 %v2870_v14 }
0x2575   :  { %v3354_v24 = vpop.eup %3353 }
0x2576   :  { %v3356_v15 = vpop.eup %3355  ;;  %v2279_v10 = vadd.f32 1.0, %v3354_v24 }
0x2577   :  { %v2280_v28 = vadd.f32 1.0, %v3356_v15 }
0x2578   :  { %3357 = vrcp.f32 %v2279_v10 }
0x2579   :  { %3359 = vrcp.f32 %v2280_v28 }
0x2585   :  { %v3358_v0 = vpop.eup %3357 }
0x2586   :  { %v3360_v30 = vpop.eup %3359  ;;  %v2285_v5 = vmul.f32 2.0, %v3358_v0  ;;  %v2295_v23 = vmul.f32 %v3358_v0, %v2291_v18 }
0x2587   :  { %v2286_v16 = vmul.f32 2.0, %v3360_v30  ;;  %v2296_v8 = vmul.f32 %v3360_v30, %v2292_v4 }
0x2588   :  { %v2871_v2 = vadd.f32 -1.0, %v2285_v5 }
0x2589   :  { %v2872_v17 = vadd.f32 -1.0, %v2286_v16 }
0x258a   :  { %2299 = vrot.lane.b32.xlu0 %v2871_v2, %s3483_s3 }
0x258b   :  { %2301 = vrot.lane.b32.xlu1 %v2872_v17, %s3483_s3 }
0x25fc   :  { %v2300_v19 = vpop.permute.xlu0 %2299 }
0x25fd   :  { %v2302_v20 = vpop.permute.xlu1 %2301  ;;  %v2305_v21 = vmul.f32 %v3358_v0, %v2300_v19 }
0x25fe   :  { %v2306_v22 = vmul.f32 %v3360_v30, %v2302_v20 }
0x25ff   :  { %2309 = vrot.lane.b32.xlu0 %v2305_v21, %s3484_s15 }
0x2600   :  { %2311 = vrot.lane.b32.xlu1 %v2306_v22, %s3484_s15 }
0x2671   :  { %v2310_v26 = vpop.permute.xlu0 %2309 }
0x2672   :  { %v2312_v29 = vpop.permute.xlu1 %2311  ;;  %v2315_v31 = vadd.f32 %v2310_v26, %v2295_v23 }
0x2673   :  { %v2316_v27 = vadd.f32 %v2312_v29, %v2296_v8 }
0x2674   :  { %3361 = vtanh.f32 %v2315_v31  ;;  %v2433_v14 = vrot.slane %v2315_v31, 7 }
0x2675   :  { %3363 = vtanh.f32 %v2316_v27  ;;  %v2434_v24 = vrot.slane %v2316_v27, 7 }
0x2681   :  { %v3362_v32 = vpop.eup %3361 }
0x2682   :  { %v3364_v33 = vpop.eup %3363  ;;  %2321 = vrot.lane.b32.xlu0 %v3362_v32, %s3483_s3 }
0x2683   :  { %2323 = vrot.lane.b32.xlu1 %v3364_v33, %s3483_s3 }
0x26f4   :  { %v2322_v35 = vpop.permute.xlu0 %2321 }
0x26f5   :  { %v2324_v36 = vpop.permute.xlu1 %2323  ;;  %v2327_v38 = vmul.f32 %v3358_v0, %v2322_v35 }
0x26f6   :  { %v2328_v39 = vmul.f32 %v3360_v30, %v2324_v36 }
0x26f7   :  { %v2331_v40 = vrot.slane %v2327_v38, 5  ;;  %v2666_v41 = vrot.slane %v2327_v38, %v3846_v47 }
0x26f8   :  { %v2332_v42 = vrot.slane %v2328_v39, 4  ;;  %v2670_v43 = vrot.slane %v2328_v39, %v3846_v47 }
0x26f9   :  { %v2671_v44 = vsel %vm1363_vm9, %v2666_v41, %v4142_v62 }
0x26fa   :  { %v2672_v45 = vsel %vm1363_vm9, %v2670_v43, %v4147_v63  ;;  %v2333_v48 = vsel %vm319_vm2, %v2332_v42, %v2331_v40 }
0x26fb   :  { %2334 = vrot.lane.b32.xlu0 %v2333_v48, %s3484_s15 }
0x276d   :  { %v2335_v50 = vpop.permute.xlu0 %2334 }
0x276e   :  { %3163 = vmatmul.mubr.msk.f32.vlgmr.msra.gmra.mxu0 %vm186_vm3, %v2335_v50 }
0x282e   :  { %v2404_v46 = vpop.f32.mrf.mxu0 }
0x282f   :  { %v2409_v49 = vrot.slane %v2404_v46, 2  ;;  %v2410_v51 = vrot.slane %v2404_v46, 3 }
0x2830   :  { %v3164_v53 = vpop.f32.mrf.mxu0 }
0x2831   :  { %v2413_v47 = vadd.f32 %v2409_v49, %v3967_v55  ;;  %v2414_v54 = vadd.f32 %v2410_v51, %v3964_v52 }
0x2833   :  { %v2874_v56 = vmul.f32 -1.442695, %v2413_v47  ;;  %v2875_v57 = vmul.f32 -1.442695, %v2414_v54 }
0x2835   :  { %3365 = vpow2.f32 %v2874_v56 }
0x2836   :  { %3367 = vpow2.f32 %v2875_v57 }
0x2842   :  { %v3366_v60 = vpop.eup %3365 }
0x2843   :  { %v3368_v59 = vpop.eup %3367  ;;  %v2421_v61 = vadd.f32 1.0, %v3366_v60 }
0x2844   :  { %v2422_v62 = vadd.f32 1.0, %v3368_v59 }
0x2845   :  { %3369 = vrcp.f32 %v2421_v61 }
0x2846   :  { %3371 = vrcp.f32 %v2422_v62 }
0x2852   :  { %v3370_v63 = vpop.eup %3369 }
0x2853   :  { %v3372_v1 = vpop.eup %3371  ;;  %v2427_v3 = vmul.f32 2.0, %v3370_v63  ;;  %v2437_v15 = vmul.f32 %v3370_v63, %v2433_v14 }
0x2854   :  { %v2428_v58 = vmul.f32 2.0, %v3372_v1  ;;  %v2438_v10 = vmul.f32 %v3372_v1, %v2434_v24 }
0x2855   :  { %v2876_v13 = vadd.f32 -1.0, %v2427_v3  ;;  %v2694_v3 = vld [vmem:[%s4251_s7 + $0x8] sm:$0xff] }
0x2856   :  { %v2877_v9 = vadd.f32 -1.0, %v2428_v58  ;;  %v2693_v58 = vld [vmem:[%s4251_s7] sm:$0xff] }
0x2857   :  { %2441 = vrot.lane.b32.xlu1 %v2876_v13, %s3483_s3 }
0x2858   :  { %2443 = vrot.lane.b32.xlu0 %v2877_v9, %s3483_s3 }
0x28c9   :  { %v2442_v11 = vpop.permute.xlu1 %2441 }
0x28ca   :  { %v2444_v7 = vpop.permute.xlu0 %2443  ;;  %v2447_v12 = vmul.f32 %v3370_v63, %v2442_v11 }
0x28cb   :  { %v2448_v6 = vmul.f32 %v3372_v1, %v2444_v7 }
0x28cc   :  { %2451 = vrot.lane.b32.xlu1 %v2447_v12, %s3484_s15 }
0x28cd   :  { %2453 = vrot.lane.b32.xlu0 %v2448_v6, %s3484_s15 }
0x293e   :  { %v2452_v28 = vpop.permute.xlu1 %2451 }
0x293f   :  { %v2454_v0 = vpop.permute.xlu0 %2453  ;;  %v2457_v30 = vadd.f32 %v2452_v28, %v2437_v15 }
0x2940   :  { %v2458_v5 = vadd.f32 %v2454_v0, %v2438_v10 }
0x2941   :  { %3373 = vtanh.f32 %v2457_v30  ;;  %v2575_v47 = vrot.slane %v2457_v30, 7 }
0x2942   :  { %3375 = vtanh.f32 %v2458_v5  ;;  %v2576_v54 = vrot.slane %v2458_v5, 7 }
0x294e   :  { %v3374_v16 = vpop.eup %3373 }
0x294f   :  { %v3376_v2 = vpop.eup %3375  ;;  %2463 = vrot.lane.b32.xlu1 %v3374_v16, %s3483_s3 }
0x2950   :  { %2465 = vrot.lane.b32.xlu0 %v3376_v2, %s3483_s3 }
0x29c1   :  { %v2464_v17 = vpop.permute.xlu1 %2463 }
0x29c2   :  { %v2466_v19 = vpop.permute.xlu0 %2465  ;;  %v2469_v20 = vmul.f32 %v3370_v63, %v2464_v17  ;;  %v2696_v63 = vld [vmem:[%s4251_s7 + $0x18] sm:$0xff] }
0x29c3   :  { %v2470_v21 = vmul.f32 %v3372_v1, %v2466_v19  ;;  %v2695_v1 = vld [vmem:[%s4251_s7 + $0x10] sm:$0xff]  ;;  %3176 = vmatprep.subr.mxu0 %v2696_v63 }
0x29c4   :  { %v2473_v22 = vrot.slane %v2469_v20, 6  ;;  %v2676_v18 = vrot.slane %v2469_v20, %v3869_v37  ;;  %3177 = vmatpush3.msra.mxu0 %v2696_v63 }
0x29c5   :  { %v2474_v4 = vrot.slane %v2470_v21, 5  ;;  %v2680_v23 = vrot.slane %v2470_v21, %v3869_v37  ;;  %3178 = vmatprep.subr.mxu0 %v2695_v1 }
0x29c6   :  { %v4194_v8 = vsel %vm1374_vm10, %v2676_v18, %v2671_v44  ;;  %3179 = vmatpush3.msra.mxu0 %v2695_v1 }
0x29c7   :  { %v2475_v26 = vsel %vm319_vm2, %v2474_v4, %v2473_v22  ;;  %v4199_v29 = vsel %vm1374_vm10, %v2680_v23, %v2672_v45  ;;  %3180 = vmatprep.subr.mxu0 %v2694_v3 }
0x29c8   :  { %2476 = vrot.lane.b32.xlu1 %v2475_v26, %s3484_s15  ;;  %3181 = vmatpush3.msra.mxu0 %v2694_v3 }
0x29c9   :  { %3182 = vmatprep.subr.mxu0 %v2693_v58 }
0x29ca   :  { %3183 = vmatpush3.msra.mxu0 %v2693_v58 }
0x2a3a   :  { %v2477_v31 = vpop.permute.xlu1 %2476 }
0x2a3b   :  { %3174 = vmatmul.mubr.msk.f32.vlgmr.msra.gmra.mxu1 %vm186_vm3, %v2477_v31 }
0x2afb   :  { %v2546_v27 = vpop.f32.mrf.mxu1 }
0x2afc   :  { %v2551_v32 = vrot.slane %v2546_v27, 1  ;;  %v2552_v33 = vrot.slane %v2546_v27, 2 }
0x2afd   :  { %v3175_v35 = vpop.f32.mrf.mxu1 }
0x2afe   :  { %v2555_v37 = vadd.f32 %v2551_v32, %v3967_v55  ;;  %v2556_v36 = vadd.f32 %v2552_v33, %v3964_v52 }
0x2b00   :  { %v2879_v38 = vmul.f32 -1.442695, %v2555_v37  ;;  %v2880_v39 = vmul.f32 -1.442695, %v2556_v36 }
0x2b02   :  { %3377 = vpow2.f32 %v2879_v38 }
0x2b03   :  { %3379 = vpow2.f32 %v2880_v39 }
0x2b0f   :  { %v3378_v40 = vpop.eup %3377 }
0x2b10   :  { %v3380_v41 = vpop.eup %3379  ;;  %v2563_v42 = vadd.f32 1.0, %v3378_v40 }
0x2b11   :  { %v2564_v43 = vadd.f32 1.0, %v3380_v41 }
0x2b12   :  { %3381 = vrcp.f32 %v2563_v42 }
0x2b13   :  { %3383 = vrcp.f32 %v2564_v43 }
0x2b1f   :  { %v3382_v44 = vpop.eup %3381 }
0x2b20   :  { %v3384_v45 = vpop.eup %3383  ;;  %v2569_v48 = vmul.f32 2.0, %v3382_v44  ;;  %v2579_v56 = vmul.f32 %v3382_v44, %v2575_v47 }
0x2b21   :  { %v2570_v50 = vmul.f32 2.0, %v3384_v45  ;;  %v2580_v57 = vmul.f32 %v3384_v45, %v2576_v54 }
0x2b22   :  { %v2881_v46 = vadd.f32 -1.0, %v2569_v48 }
0x2b23   :  { %v2882_v49 = vadd.f32 -1.0, %v2570_v50 }
0x2b24   :  { %2583 = vrot.lane.b32.xlu0 %v2881_v46, %s3483_s3 }
0x2b25   :  { %2585 = vrot.lane.b32.xlu1 %v2882_v49, %s3483_s3 }
0x2b96   :  { %v2584_v52 = vpop.permute.xlu0 %2583 }
0x2b97   :  { %v2586_v55 = vpop.permute.xlu1 %2585  ;;  %v2589_v51 = vmul.f32 %v3382_v44, %v2584_v52 }
0x2b98   :  { %v2590_v53 = vmul.f32 %v3384_v45, %v2586_v55 }
0x2b99   :  { %2593 = vrot.lane.b32.xlu0 %v2589_v51, %s3484_s15 }
0x2b9a   :  { %2595 = vrot.lane.b32.xlu1 %v2590_v53, %s3484_s15 }
0x2c0b   :  { %v2594_v60 = vpop.permute.xlu0 %2593 }
0x2c0c   :  { %v2596_v59 = vpop.permute.xlu1 %2595  ;;  %v2599_v61 = vadd.f32 %v2594_v60, %v2579_v56 }
0x2c0d   :  { %v2600_v62 = vadd.f32 %v2596_v59, %v2580_v57 }
0x2c0e   :  { %3385 = vtanh.f32 %v2599_v61 }
0x2c0f   :  { %3387 = vtanh.f32 %v2600_v62 }
0x2c1b   :  { %v3386_v13 = vpop.eup %3385 }
0x2c1c   :  { %v3388_v9 = vpop.eup %3387  ;;  %2605 = vrot.lane.b32.xlu0 %v3386_v13, %s3483_s3 }
0x2c1d   :  { %2607 = vrot.lane.b32.xlu1 %v3388_v9, %s3483_s3 }
0x2c8e   :  { %v2606_v11 = vpop.permute.xlu0 %2605 }
0x2c8f   :  { %v2608_v7 = vpop.permute.xlu1 %2607  ;;  %v2611_v12 = vmul.f32 %v3382_v44, %v2606_v11 }
0x2c90   :  { %v2612_v6 = vmul.f32 %v3384_v45, %v2608_v7 }
0x2c91   :  { %v2686_v14 = vrot.slane %v2611_v12, %v3934_v34 }
0x2c92   :  { %v2690_v24 = vrot.slane %v2612_v6, %v3934_v34  ;;  %v2883_v34 = vld [vmem:[%s4252_s8] ss:$0 sm:$0xff] }
0x2c93   :  { %v2691_v15 = vsel %vm1385_vm11, %v2686_v14, %v4194_v8 }
0x2c94   :  { %v2692_v10 = vsel %vm1385_vm11, %v2690_v24, %v4199_v29  ;;  %2706 = vrot.lane.b32.xlu0 %v2691_v15, %s3484_s15 }
0x2c95   :  { %2708 = vrot.lane.b32.xlu1 %v2692_v10, %s3484_s15 }
0x2d06   :  { %v2707_v28 = vpop.permute.xlu0 %2706 }
0x2d07   :  { %v2709_v0 = vpop.permute.xlu1 %2708  ;;  %3184 = vmatprep.mubr.msk.f32.mxu0 %vm186_vm3, %v2707_v28 }
0x2d08   :  { %3185 = vmatmul.mubr.msk.f32.vlgmr.msra.gmra.mxu0 %vm186_vm3, %v2709_v0 }
0x2dc8   :  { %v3186_v30 = vpop.f32.mrf.mxu0 }
0x2dc9   :  { %v2786_v5 = vadd.f32 %v3186_v30, %v2883_v34 }
0x2dca   :  { %v2780_v16 = vpop.f32.mrf.mxu0 }
0x2dcb   :  { %2791 = vst.msk [vmem:[%s4253_s9 + $0x8] sm:$0xff] %vm2789_vm12, %v2786_v5  ;;  %v2781_v25 = vadd.f32 %v2883_v34, %v2780_v16 }
0x2dcd   :  { %2790 = vst.msk [vmem:[%s4253_s9] sm:$0xff] %vm2789_vm12, %v2781_v25 }
0x2dce   :  { %2796 = vsyncpa [#allocation3], 1 }
0x2dcf   :  { %2797 = vsyncpa [#allocation5], 1 }
0x2dd0   :  { %2798 = vsyncpa [#allocation8], 1 }

</bundles_post_ra>
